<compile_context>
chip_gen: v5e
topology: v5e:2x2
jax: 0.10.0
libtpu: 0.0.40
codegen_flags: <defaults>
</compile_context>

<pallas_src>
import jax
import jax.numpy as jnp
from jax.experimental import pallas as pl
from jax.experimental.pallas import tpu as pltpu


def _round_up(x, m):
    return ((x + m - 1) // m) * m


def _make_mlp_kernel(n_joints):
    def kernel(x_ref, w1_ref, eb1_ref, w2_ref, b2_ref, w3_ref, b3_ref, o_ref):
        x = x_ref[...]                                     # (TM, n_joints) f32
        if n_joints == 1:
            # (TM,1) * (1,H1) + (1,H1) -> (TM,H1): pure VPU, no MXU pass.
            h = x * w1_ref[...] + eb1_ref[...]
        else:
            h = jnp.dot(x, w1_ref[...], preferred_element_type=jnp.float32)
            h = h + eb1_ref[...]
        h = jnp.maximum(h, 0.0)

        # Layer 2: bf16 operands, f32 accumulation; bias/ReLU in f32.
        h = jnp.dot(h.astype(w2_ref.dtype), w2_ref[...],
                    preferred_element_type=jnp.float32) + b2_ref[...]
        h = jnp.maximum(h, 0.0)

        # Layer 3: bf16 operands, f32 accumulation, no activation.
        o = jnp.dot(h.astype(w3_ref.dtype), w3_ref[...],
                    preferred_element_type=jnp.float32) + b3_ref[...]
        o_ref[...] = o.astype(o_ref.dtype)

    return kernel


def gripper_decoder_mlp(x, w1j, eff_b1, w2, b2, w3, b3, *, block_b=256):
    """(B, n_joints) joint features -> (B, n_points*3) via the 3-layer MLP."""
    B, n_joints = x.shape
    h1 = w2.shape[0]
    h2, d_out = w3.shape

    # Batch tile: multiple of 8 (sublane), capped at block_b; pad B to whole tiles.
    tm = min(block_b, _round_up(max(B, 1), 8))
    b_pad = _round_up(B, tm)
    if b_pad != B:
        x = jnp.pad(x, ((0, b_pad - B), (0, 0)))
    grid = (b_pad // tm,)

    nbytes = lambda a: int(a.size) * a.dtype.itemsize
    cost = pl.CostEstimate(
        flops=2 * b_pad * (n_joints * h1 + h1 * h2 + h2 * d_out),
        transcendentals=0,
        bytes_accessed=(nbytes(x) + nbytes(w1j) + nbytes(eff_b1) + nbytes(w2)
                        + nbytes(b2) + nbytes(w3) + nbytes(b3)
                        + b_pad * d_out * 4),
    )

    # Weights/biases: constant index_map -> stay VMEM-resident across grid steps.
    resident = lambda shape: pl.BlockSpec(shape, lambda i: (0, 0))

    out = pl.pallas_call(
        _make_mlp_kernel(n_joints),
        out_shape=jax.ShapeDtypeStruct((b_pad, d_out), jnp.float32),
        grid_spec=pltpu.PrefetchScalarGridSpec(
            num_scalar_prefetch=0,
            grid=grid,
            in_specs=[
                pl.BlockSpec((tm, n_joints), lambda i: (i, 0)),  # x: pipelined
                resident((n_joints, h1)),                        # w1 (joint cols)
                resident((1, h1)),                               # eff_b1
                resident((h1, h2)),                              # w2 (bf16)
                resident((1, h2)),                               # b2
                resident((h2, d_out)),                           # w3 (bf16)
                resident((1, d_out)),                            # b3
            ],
            out_specs=pl.BlockSpec((tm, d_out), lambda i: (i, 0)),
        ),
        compiler_params=pltpu.CompilerParams(
            dimension_semantics=("parallel",),
        ),
        cost_estimate=cost,
    )(x, w1j, eff_b1, w2, b2, w3, b3)

    return out[:B] if b_pad != B else out


class GripperDecoderWithLatentVector:
    """JAX/Pallas re-implementation of the PyTorch module's forward pass."""

    def __init__(self, key, n_joints=1, n_points=256, layers=(256, 512), n_latent=16):
        if len(layers) != 2:
            raise NotImplementedError("currently only exactly two layers supported")
        self.n_joints = n_joints
        self.n_points = n_points
        self.n_latent = n_latent

        k_lat, k1, k2, k3, kb1, kb2, kb3 = jax.random.split(key, 7)
        d_in = n_joints + n_latent
        h1, h2 = layers
        d_out = n_points * 3

        def uniform(k, shape, fan_in):
            # deterministic kaiming-uniform-like init (synthetic weights)
            bound = (6.0 / fan_in) ** 0.5
            return jax.random.uniform(k, shape, jnp.float32, -bound, bound)

        # latent vector: (1, n_latent)
        self.latent_vector = uniform(k_lat, (1, n_latent), n_latent)
        # weights stored as (in, out) == transpose of torch's nn.Linear.weight.
        # w1 is tiny -> keep f32; w2/w3 dominate HBM traffic -> store bf16.
        self.w1 = uniform(k1, (d_in, h1), d_in)
        self.b1 = uniform(kb1, (1, h1), d_in)
        self.w2 = uniform(k2, (h1, h2), h1).astype(jnp.bfloat16)
        self.b2 = uniform(kb2, (1, h2), h1)
        self.w3 = uniform(k3, (h2, d_out), h2).astype(jnp.bfloat16)
        self.b3 = uniform(kb3, (1, d_out), h2)

    def __call__(self, x):
        # x: arbitrary shape, reshaped to (-1, n_joints)  (matches torch.reshape)
        x = jnp.reshape(x, (-1, self.n_joints)).astype(jnp.float32)
        # Fold the constant latent contribution into an effective first-layer bias:
        #   concat([x, latent]) @ w1 + b1 == x @ w1[:nj] + (latent @ w1[nj:] + b1)
        eff_b1 = self.latent_vector @ self.w1[self.n_joints:] + self.b1
        w1j = self.w1[: self.n_joints]
        out = gripper_decoder_mlp(x, w1j, eff_b1, self.w2, self.b2,
                                  self.w3, self.b3)
        return jnp.reshape(out, (-1, self.n_points, 3))


def _reference_forward(model, x):
    """Pure-JAX reference (same parameters / same bf16 weight storage)."""
    x = jnp.reshape(x, (-1, model.n_joints)).astype(jnp.float32)
    B = x.shape[0]
    latent = jnp.broadcast_to(model.latent_vector, (B, model.n_latent))
    h = jnp.concatenate([x, latent], axis=1)
    h = jnp.maximum(h @ model.w1 + model.b1, 0.0)
    h = jnp.maximum(jnp.dot(h.astype(jnp.bfloat16), model.w2,
                            preferred_element_type=jnp.float32) + model.b2, 0.0)
    h = jnp.dot(h.astype(jnp.bfloat16), model.w3,
                preferred_element_type=jnp.float32) + model.b3
    return jnp.reshape(h, (-1, model.n_points, 3))


if __name__ == "__main__":
    key = jax.random.PRNGKey(0)
    k_model, k_x, k_model2, k_x2 = jax.random.split(key, 4)

    # n_joints=1, n_points=256: input (2, 4) -> flattened batch of 8 joint configs.
    model = GripperDecoderWithLatentVector(
        k_model, n_joints=1, n_points=256, layers=(256, 512), n_latent=16)
    x = jax.random.uniform(k_x, (2, 4), jnp.float32)

    out = jax.block_until_ready(model(x))
    ref = _reference_forward(model, x)
    assert out.shape == (8, 256, 3), out.shape
    assert jnp.allclose(out, ref, atol=1e-3, rtol=1e-3), "mismatch vs JAX reference"

    # Second config exercises n_joints > 1 (layer-1 dot path) and a batch size
    # that is not a multiple of the sublane tile (padding + slice).
    model2 = GripperDecoderWithLatentVector(
        k_model2, n_joints=2, n_points=256, layers=(256, 512), n_latent=16)
    x2 = jax.random.uniform(k_x2, (3, 2), jnp.float32)   # -> (3, 2) joint configs
    out2 = jax.block_until_ready(model2(x2))
    ref2 = _reference_forward(model2, x2)
    assert out2.shape == (3, 256, 3), out2.shape
    assert jnp.allclose(out2, ref2, atol=1e-3, rtol=1e-3), "mismatch (n_joints=2)"

    print("KERNEL_OK")
</pallas_src>

<mosaic_0001>
module attributes {stable_mosaic.version = 11 : i64} {
  func.func @kernel(%arg0: i32, %arg1: memref<8x1xf32, #tpu.memory_space<vmem>>, %arg2: memref<1x256xf32, #tpu.memory_space<vmem>>, %arg3: memref<1x256xf32, #tpu.memory_space<vmem>>, %arg4: memref<256x512xbf16, #tpu.memory_space<vmem>>, %arg5: memref<1x512xf32, #tpu.memory_space<vmem>>, %arg6: memref<512x768xbf16, #tpu.memory_space<vmem>>, %arg7: memref<1x768xf32, #tpu.memory_space<vmem>>, %arg8: memref<8x768xf32, #tpu.memory_space<vmem>>) attributes {dimension_semantics = [#tpu.dimension_semantics<parallel>], iteration_bounds = array<i64: 1>, scalar_prefetch = 0 : i64, scratch_operands = 0 : i64, tpu.core_type = #tpu.core_type<tc>, window_params = [{transform_indices = @transform_0, window_bounds = array<i64: 8, 1>}, {pipeline_mode = #tpu.pipeline_mode<synchronous>, transform_indices = @transform_1, window_bounds = array<i64: 1, 256>}, {pipeline_mode = #tpu.pipeline_mode<synchronous>, transform_indices = @transform_2, window_bounds = array<i64: 1, 256>}, {pipeline_mode = #tpu.pipeline_mode<synchronous>, transform_indices = @transform_3, window_bounds = array<i64: 256, 512>}, {pipeline_mode = #tpu.pipeline_mode<synchronous>, transform_indices = @transform_4, window_bounds = array<i64: 1, 512>}, {pipeline_mode = #tpu.pipeline_mode<synchronous>, transform_indices = @transform_5, window_bounds = array<i64: 512, 768>}, {pipeline_mode = #tpu.pipeline_mode<synchronous>, transform_indices = @transform_6, window_bounds = array<i64: 1, 768>}, {transform_indices = @transform_7, window_bounds = array<i64: 8, 768>}]} {
    %c0 = arith.constant 0 : index
    %c0_0 = arith.constant 0 : index
    %0 = vector.load %arg1[%c0, %c0_0] : memref<8x1xf32, #tpu.memory_space<vmem>>, vector<8x1xf32>
    %c0_1 = arith.constant 0 : index
    %c0_2 = arith.constant 0 : index
    %1 = vector.load %arg2[%c0_1, %c0_2] : memref<1x256xf32, #tpu.memory_space<vmem>>, vector<1x256xf32>
    %2 = vector.broadcast %0 : vector<8x1xf32> to vector<8x256xf32>
    %3 = vector.broadcast %1 : vector<1x256xf32> to vector<8x256xf32>
    %4 = arith.mulf %2, %3 : vector<8x256xf32>
    %c0_3 = arith.constant 0 : index
    %c0_4 = arith.constant 0 : index
    %5 = vector.load %arg3[%c0_3, %c0_4] : memref<1x256xf32, #tpu.memory_space<vmem>>, vector<1x256xf32>
    %6 = vector.broadcast %5 : vector<1x256xf32> to vector<8x256xf32>
    %7 = arith.addf %4, %6 : vector<8x256xf32>
    %cst = arith.constant 0.000000e+00 : f32
    %8 = vector.broadcast %cst : f32 to vector<8x256xf32>
    %9 = arith.maximumf %7, %8 : vector<8x256xf32>
    %10 = arith.truncf %9 : vector<8x256xf32> to vector<8x256xbf16>
    %c0_5 = arith.constant 0 : index
    %c0_6 = arith.constant 0 : index
    %11 = vector.load %arg4[%c0_5, %c0_6] : memref<256x512xbf16, #tpu.memory_space<vmem>>, vector<256x512xbf16>
    %cst_7 = arith.constant dense<0.000000e+00> : vector<8x512xf32>
    %12 = tpu.matmul %10, %11, %cst_7 {dimension_numbers = #tpu.dot_dimension_numbers<[1], [0], [0], [1], [0, 0, 1, 1], [], []>} : vector<8x256xbf16>, vector<256x512xbf16>, vector<8x512xf32> -> vector<8x512xf32>
    %c0_8 = arith.constant 0 : index
    %c0_9 = arith.constant 0 : index
    %13 = vector.load %arg5[%c0_8, %c0_9] : memref<1x512xf32, #tpu.memory_space<vmem>>, vector<1x512xf32>
    %14 = vector.broadcast %13 : vector<1x512xf32> to vector<8x512xf32>
    %15 = arith.addf %12, %14 : vector<8x512xf32>
    %cst_10 = arith.constant 0.000000e+00 : f32
    %16 = vector.broadcast %cst_10 : f32 to vector<8x512xf32>
    %17 = arith.maximumf %15, %16 : vector<8x512xf32>
    %18 = arith.truncf %17 : vector<8x512xf32> to vector<8x512xbf16>
    %c0_11 = arith.constant 0 : index
    %c0_12 = arith.constant 0 : index
    %19 = vector.load %arg6[%c0_11, %c0_12] : memref<512x768xbf16, #tpu.memory_space<vmem>>, vector<512x768xbf16>
    %cst_13 = arith.constant dense<0.000000e+00> : vector<8x768xf32>
    %20 = tpu.matmul %18, %19, %cst_13 {dimension_numbers = #tpu.dot_dimension_numbers<[1], [0], [0], [1], [0, 0, 1, 1], [], []>} : vector<8x512xbf16>, vector<512x768xbf16>, vector<8x768xf32> -> vector<8x768xf32>
    %c0_14 = arith.constant 0 : index
    %c0_15 = arith.constant 0 : index
    %21 = vector.load %arg7[%c0_14, %c0_15] : memref<1x768xf32, #tpu.memory_space<vmem>>, vector<1x768xf32>
    %22 = vector.broadcast %21 : vector<1x768xf32> to vector<8x768xf32>
    %23 = arith.addf %20, %22 : vector<8x768xf32>
    %c0_16 = arith.constant 0 : index
    %c0_17 = arith.constant 0 : index
    %24 = vector.load %arg8[%c0_16, %c0_17] : memref<8x768xf32, #tpu.memory_space<vmem>>, vector<8x768xf32>
    tpu.vector_store %arg8[%c0_16, %c0_17], %23 {strides = array<i32>} : memref<8x768xf32, #tpu.memory_space<vmem>>, vector<8x768xf32>,
    return
  }
  func.func @transform_0(%arg0: i32) -> (i32, i32) {
    %c0_i32 = arith.constant 0 : i32
    %c0_i32_0 = arith.constant 0 : i32
    return %arg0, %c0_i32 : i32, i32
  }
  func.func @transform_1(%arg0: i32) -> (i32, i32) {
    %c0_i32 = arith.constant 0 : i32
    %c0_i32_0 = arith.constant 0 : i32
    %c0_i32_1 = arith.constant 0 : i32
    return %c0_i32, %c0_i32_0 : i32, i32
  }
  func.func @transform_2(%arg0: i32) -> (i32, i32) {
    %c0_i32 = arith.constant 0 : i32
    %c0_i32_0 = arith.constant 0 : i32
    %c0_i32_1 = arith.constant 0 : i32
    return %c0_i32, %c0_i32_0 : i32, i32
  }
  func.func @transform_3(%arg0: i32) -> (i32, i32) {
    %c0_i32 = arith.constant 0 : i32
    %c0_i32_0 = arith.constant 0 : i32
    %c0_i32_1 = arith.constant 0 : i32
    return %c0_i32, %c0_i32_0 : i32, i32
  }
  func.func @transform_4(%arg0: i32) -> (i32, i32) {
    %c0_i32 = arith.constant 0 : i32
    %c0_i32_0 = arith.constant 0 : i32
    %c0_i32_1 = arith.constant 0 : i32
    return %c0_i32, %c0_i32_0 : i32, i32
  }
  func.func @transform_5(%arg0: i32) -> (i32, i32) {
    %c0_i32 = arith.constant 0 : i32
    %c0_i32_0 = arith.constant 0 : i32
    %c0_i32_1 = arith.constant 0 : i32
    return %c0_i32, %c0_i32_0 : i32, i32
  }
  func.func @transform_6(%arg0: i32) -> (i32, i32) {
    %c0_i32 = arith.constant 0 : i32
    %c0_i32_0 = arith.constant 0 : i32
    %c0_i32_1 = arith.constant 0 : i32
    return %c0_i32, %c0_i32_0 : i32, i32
  }
  func.func @transform_7(%arg0: i32) -> (i32, i32) {
    %c0_i32 = arith.constant 0 : i32
    %c0_i32_0 = arith.constant 0 : i32
    return %arg0, %c0_i32 : i32, i32
  }
}

</mosaic_0001>

<bundles_post_ra>
// kernel: tpu_custom_call.1
= control target key start
LH: loop header
LB: loop body
LE: loop exit
PB: predicated region body
PF: predicated region fallthrough
CT: control target
= control target key end

     0   :  { %12 = vsyncpa [#allocation3], 0  ;;  %s3672_s0 = inlined_call_operand.vmem [shape: f32[8,1], index: 0, kind: input, shape index: {}]   ;;  %s3673_s1 = inlined_call_operand.hbm [shape: f32[1,256], index: 1, kind: input, shape index: {}]   ;;  %s3674_s2 = inlined_call_operand.hbm [shape: f32[1,256], index: 2, kind: input, shape index: {}]   ;;  %s3675_s3 = inlined_call_operand.hbm [shape: bf16[256,512], index: 3, kind: input, shape index: {}]   ;;  %s3676_s4 = inlined_call_operand.vmem [shape: f32[1,512], index: 4, kind: input, shape index: {}]   ;;  %s3677_s5 = inlined_call_operand.hbm [shape: bf16[512,768], index: 5, kind: input, shape index: {}]   ;;  %s3678_s6 = inlined_call_operand.vmem [shape: f32[1,768], index: 6, kind: input, shape index: {}]   ;;  %s3679_s7 = inlined_call_operand.hbm [shape: f32[8,768], index: 7, kind: output, shape index: {}]  }
   0x1   :  { %13 = vsyncpa [#allocation6], 0 }
   0x2   :  { %14 = vsyncpa [#allocation9], 0  ;;  %s34_s26 = sshll.u32 %s3674_s2, 4  ;;  %s35_s26 = int_to_ptr.hbm [resolvable:$true] %s34_s26 }
   0x3   :  { %15 = vsyncpa [#allocation4], 0  ;;  %s3540_s27 = smov [#allocation5]   ;;  %s23_s8 = sshll.u32 %s3673_s1, 4  ;;  %s24_s8 = int_to_ptr.hbm [resolvable:$true] %s23_s8 }
   0x4   :  { %s36_s28 = sshll.u32 %s3540_s27, 4  ;;  %s3541_s9 = smov [#allocation2]   ;;  %s37_s28 = int_to_ptr.vmem [resolvable:$true] %s36_s28 }
   0x5   :  { %39 = dma.hbm_to_vmem [thread:$0]  %s35_s26, 32, %s37_s28, [#allocation6]  }
   0x6   :  { %s25_s10 = sshll.u32 %s3541_s9, 4  ;;  %s44_s13 = sshll.u32 %s3675_s3, 4  ;;  %s26_s10 = int_to_ptr.vmem [resolvable:$true] %s25_s10  ;;  %s45_s13 = int_to_ptr.hbm [resolvable:$true] %s44_s13 }
   0x7   :  { %28 = dma.hbm_to_vmem [thread:$0]  %s24_s8, 32, %s26_s10, [#allocation3]  }
   0x8   :  { %s3542_s2 = smov [#allocation7]   ;;  %s59_s17 = sshll.u32 %s3677_s5, 4  ;;  %s60_s17 = int_to_ptr.hbm [resolvable:$true] %s59_s17 }
   0x9   :  { %s46_s14 = sshll.u32 %s3542_s2, 4  ;;  %s3543_s18 = smov 256   ;;  %s47_s14 = int_to_ptr.vmem [resolvable:$true] %s46_s14 }
   0xa   :  { %s3544_s1 = smov 16   ;;  %s3545_s19 = smov [#allocation8]  }
   0xb   :  { %52 = dma.hbm_to_vmem [thread:$0]  %s45_s13, 8192, %s47_s14, [#allocation6], %s3543_s18, %s3543_s18, %s3544_s1  }
   0xc   :  { %s61_s20 = sshll.u32 %s3545_s19, 4  ;;  %s3546_s21 = smov 384   ;;  %s62_s20 = int_to_ptr.vmem [resolvable:$true] %s61_s20 }
   0xd   :  { %s3547_s22 = smov 24  }
   0xe   :  { %67 = dma.hbm_to_vmem [thread:$0]  %s60_s17, 24576, %s62_s20, [#allocation9], %s3546_s21, %s3546_s21, %s3547_s22  }
   0xf   :  { %3532 = dma.done.wait [#allocation3], 32  }
  0x10   :  { %3533 = vsyncadd [#allocation3], 4294967264 }
  0x11   :  { %3534 = dma.done.wait [#allocation6], 8224  }
  0x12   :  { %3535 = vsyncadd [#allocation6], 4294959072 }
  0x13   :  { %3536 = dma.done.wait [#allocation9], 24576  }
  0x14   :  { %3537 = vsyncadd [#allocation9], 4294942720  ;;  %v3548_v0 = vmov 0   ;;  %v86_v1 = vld [vmem:[%s3672_s0] sm:$0xff]  ;;  %v3175_v3 = vld [vmem:[#allocation7 + $0xec] sm:$0xf0] }
  0x15   :  { %3411 = vset.pattern.permute.xlu0 %v3548_v0  ;;  %v2235_v2 = vld [vmem:[#allocation7 + $0xe0] sm:$0xf]  ;;  %v3207_v6 = vld [vmem:[#allocation7 + $0x1ec] sm:$0xf0]  ;;  %v3173_v7 = vld [vmem:[#allocation7 + $0xe4] sm:$0xf] }
  0x16   :  { %90 = vperm.xlu0 %3411, %v86_v1   ;;  %v2236_v4 = vor.u32 %v3175_v3, %v2235_v2  ;;  %v2363_v5 = vld [vmem:[#allocation7 + $0x1e0] sm:$0xf]  ;;  %v2237_v9 = vld [vmem:[#allocation7 + $0xf0] sm:$0xf0]  ;;  %v3205_v10 = vld [vmem:[#allocation7 + $0x1e4] sm:$0xf] }
  0x17   :  { %v2364_v8 = vor.u32 %v3207_v6, %v2363_v5  ;;  %v2365_v11 = vld [vmem:[#allocation7 + $0x1f0] sm:$0xf0]  ;;  %v2240_v12 = vor.u32 %v3173_v7, %v2237_v9  ;;  %v2219_v14 = vld [vmem:[#allocation7 + $0xc0] sm:$0xf]  ;;  %v3171_v15 = vld [vmem:[#allocation7 + $0xcc] sm:$0xf0] }
  0x18   :  { %506 = vmatpush.bf16.msra.mxu0 %v2236_v4  ;;  %v2368_v13 = vor.u32 %v3205_v10, %v2365_v11  ;;  %v2347_v16 = vld [vmem:[#allocation7 + $0x1c0] sm:$0xf]  ;;  %v2220_v17 = vor.u32 %v3171_v15, %v2219_v14  ;;  %v3203_v18 = vld [vmem:[#allocation7 + $0x1cc] sm:$0xf0]  ;;  %v3169_v19 = vld [vmem:[#allocation7 + $0xc4] sm:$0xf] }
  0x19   :  { %519 = vmatpush.bf16.msra.mxu1 %v2364_v8  ;;  %v2221_v20 = vld [vmem:[#allocation7 + $0xd0] sm:$0xf0]  ;;  %532 = vmatpush.bf16.msra.mxu2 %v2240_v12  ;;  %v2348_v21 = vor.u32 %v3203_v18, %v2347_v16  ;;  %v3201_v23 = vld [vmem:[#allocation7 + $0x1c4] sm:$0xf]  ;;  %v2203_v25 = vld [vmem:[#allocation7 + $0xa0] sm:$0xf] }
  0x1a   :  { %545 = vmatpush.bf16.msra.mxu3 %v2368_v13  ;;  %v2224_v22 = vor.u32 %v3169_v19, %v2221_v20  ;;  %v2349_v24 = vld [vmem:[#allocation7 + $0x1d0] sm:$0xf0]  ;;  %v3167_v27 = vld [vmem:[#allocation7 + $0xac] sm:$0xf0]  ;;  %v2331_v28 = vld [vmem:[#allocation7 + $0x1a0] sm:$0xf] }
  0x1b   :  { %v2352_v26 = vor.u32 %v3201_v23, %v2349_v24  ;;  %v3199_v29 = vld [vmem:[#allocation7 + $0x1ac] sm:$0xf0]  ;;  %v2204_v30 = vor.u32 %v3167_v27, %v2203_v25  ;;  %v3165_v31 = vld [vmem:[#allocation7 + $0xa4] sm:$0xf]  ;;  %v2205_v32 = vld [vmem:[#allocation7 + $0xb0] sm:$0xf0] }
  0x1c   :  { %507 = vmatpush.bf16.msra.mxu0 %v2220_v17  ;;  %v3197_v33 = vld [vmem:[#allocation7 + $0x1a4] sm:$0xf]  ;;  %v2332_v34 = vor.u32 %v3199_v29, %v2331_v28  ;;  %v2333_v35 = vld [vmem:[#allocation7 + $0x1b0] sm:$0xf0]  ;;  %v2187_v36 = vld [vmem:[#allocation7 + $0x80] sm:$0xf]  ;;  %v2208_v38 = vor.u32 %v3165_v31, %v2205_v32 }
  0x1d   :  { %520 = vmatpush.bf16.msra.mxu1 %v2348_v21  ;;  %v3163_v37 = vld [vmem:[#allocation7 + $0x8c] sm:$0xf0]  ;;  %533 = vmatpush.bf16.msra.mxu2 %v2224_v22  ;;  %v2336_v39 = vor.u32 %v3197_v33, %v2333_v35  ;;  %v2315_v40 = vld [vmem:[#allocation7 + $0x180] sm:$0xf]  ;;  %v3161_v42 = vld [vmem:[#allocation7 + $0x84] sm:$0xf] }
  0x1e   :  { %546 = vmatpush.bf16.msra.mxu3 %v2352_v26  ;;  %v3195_v41 = vld [vmem:[#allocation7 + $0x18c] sm:$0xf0]  ;;  %v2189_v43 = vld [vmem:[#allocation7 + $0x90] sm:$0xf0]  ;;  %v3193_v44 = vld [vmem:[#allocation7 + $0x184] sm:$0xf]  ;;  %v2188_v46 = vor.u32 %v3163_v37, %v2187_v36 }
  0x1f   :  { %v2317_v45 = vld [vmem:[#allocation7 + $0x190] sm:$0xf0]  ;;  %v2316_v47 = vor.u32 %v3195_v41, %v2315_v40  ;;  %v2171_v48 = vld [vmem:[#allocation7 + $0x60] sm:$0xf]  ;;  %v3159_v49 = vld [vmem:[#allocation7 + $0x6c] sm:$0xf0]  ;;  %v2192_v50 = vor.u32 %v3161_v42, %v2189_v43 }
  0x20   :  { %508 = vmatpush.bf16.msra.mxu0 %v2204_v30  ;;  %v2320_v51 = vor.u32 %v3193_v44, %v2317_v45  ;;  %v2299_v52 = vld [vmem:[#allocation7 + $0x160] sm:$0xf]  ;;  %v3191_v53 = vld [vmem:[#allocation7 + $0x16c] sm:$0xf0]  ;;  %v3157_v54 = vld [vmem:[#allocation7 + $0x64] sm:$0xf]  ;;  %v2172_v58 = vor.u32 %v3159_v49, %v2171_v48 }
  0x21   :  { %521 = vmatpush.bf16.msra.mxu1 %v2332_v34  ;;  %534 = vmatpush.bf16.msra.mxu2 %v2208_v38  ;;  %v2173_v55 = vld [vmem:[#allocation7 + $0x70] sm:$0xf0]  ;;  %v3189_v56 = vld [vmem:[#allocation7 + $0x164] sm:$0xf]  ;;  %v2300_v59 = vor.u32 %v3191_v53, %v2299_v52  ;;  %v2155_v60 = vld [vmem:[#allocation7 + $0x40] sm:$0xf] }
  0x22   :  { %547 = vmatpush.bf16.msra.mxu3 %v2336_v39  ;;  %v2301_v57 = vld [vmem:[#allocation7 + $0x170] sm:$0xf0]  ;;  %v3155_v61 = vld [vmem:[#allocation7 + $0x4c] sm:$0xf0]  ;;  %v2176_v62 = vor.u32 %v3157_v54, %v2173_v55  ;;  %v2283_v0 = vld [vmem:[#allocation7 + $0x140] sm:$0xf] }
  0x23   :  { %v2304_v63 = vor.u32 %v3189_v56, %v2301_v57  ;;  %v3187_v1 = vld [vmem:[#allocation7 + $0x14c] sm:$0xf0]  ;;  %v3153_v2 = vld [vmem:[#allocation7 + $0x44] sm:$0xf]  ;;  %v2157_v3 = vld [vmem:[#allocation7 + $0x50] sm:$0xf0]  ;;  %v2156_v6 = vor.u32 %v3155_v61, %v2155_v60 }
  0x24   :  { %509 = vmatpush.bf16.msra.mxu0 %v2188_v46  ;;  %v3185_v4 = vld [vmem:[#allocation7 + $0x144] sm:$0xf]  ;;  %v2285_v5 = vld [vmem:[#allocation7 + $0x150] sm:$0xf0]  ;;  %v2284_v7 = vor.u32 %v3187_v1, %v2283_v0  ;;  %v2139_v8 = vld [vmem:[#allocation7 + $0x20] sm:$0xf]  ;;  %v2160_v10 = vor.u32 %v3153_v2, %v2157_v3 }
  0x25   :  { %522 = vmatpush.bf16.msra.mxu1 %v2316_v47  ;;  %535 = vmatpush.bf16.msra.mxu2 %v2192_v50  ;;  %v3151_v9 = vld [vmem:[#allocation7 + $0x2c] sm:$0xf0]  ;;  %v2288_v11 = vor.u32 %v3185_v4, %v2285_v5  ;;  %v2267_v12 = vld [vmem:[#allocation7 + $0x120] sm:$0xf]  ;;  %v3149_v14 = vld [vmem:[#allocation7 + $0x24] sm:$0xf] }
  0x26   :  { %548 = vmatpush.bf16.msra.mxu3 %v2320_v51  ;;  %v3183_v13 = vld [vmem:[#allocation7 + $0x12c] sm:$0xf0]  ;;  %v2141_v15 = vld [vmem:[#allocation7 + $0x30] sm:$0xf0]  ;;  %v3181_v16 = vld [vmem:[#allocation7 + $0x124] sm:$0xf]  ;;  %v2140_v18 = vor.u32 %v3151_v9, %v2139_v8 }
  0x27   :  { %v2269_v17 = vld [vmem:[#allocation7 + $0x130] sm:$0xf0]  ;;  %v2123_v19 = vld [vmem:[#allocation7] sm:$0xf]  ;;  %v3147_v20 = vld [vmem:[#allocation7 + $0xc] sm:$0xf0]  ;;  %v2268_v21 = vor.u32 %v3183_v13, %v2267_v12  ;;  %v2144_v25 = vor.u32 %v3149_v14, %v2141_v15 }
  0x28   :  { %510 = vmatpush.bf16.msra.mxu0 %v2172_v58  ;;  %v2251_v22 = vld [vmem:[#allocation7 + $0x100] sm:$0xf]  ;;  %v3179_v23 = vld [vmem:[#allocation7 + $0x10c] sm:$0xf0]  ;;  %v3145_v24 = vld [vmem:[#allocation7 + $0x4] sm:$0xf]  ;;  %v2272_v26 = vor.u32 %v3181_v16, %v2269_v17  ;;  %v2124_v33 = vor.u32 %v3147_v20, %v2123_v19 }
  0x29   :  { %523 = vmatpush.bf16.msra.mxu1 %v2300_v59  ;;  %536 = vmatpush.bf16.msra.mxu2 %v2176_v62  ;;  %v2125_v27 = vld [vmem:[#allocation7 + $0x10] sm:$0xf0]  ;;  %v2243_v28 = vld [vmem:[#allocation7 + $0xe8] sm:$0xf]  ;;  %v3176_v29 = vld [vmem:[#allocation7 + $0xf4] sm:$0xf0]  ;;  %v2252_v37 = vor.u32 %v3179_v23, %v2251_v22 }
  0x2a   :  { %549 = vmatpush.bf16.msra.mxu3 %v2304_v63  ;;  %v3177_v30 = vld [vmem:[#allocation7 + $0x104] sm:$0xf]  ;;  %v2253_v31 = vld [vmem:[#allocation7 + $0x110] sm:$0xf0]  ;;  %v2371_v32 = vld [vmem:[#allocation7 + $0x1e8] sm:$0xf]  ;;  %v2244_v38 = vor.u32 %v3176_v29, %v2243_v28  ;;  %v2128_v41 = vor.u32 %v3145_v24, %v2125_v27 }
  0x2b   :  { %v3208_v34 = vld [vmem:[#allocation7 + $0x1f4] sm:$0xf0]  ;;  %v3174_v35 = vld [vmem:[#allocation7 + $0xec] sm:$0xf]  ;;  %v2245_v36 = vld [vmem:[#allocation7 + $0xf8] sm:$0xf0]  ;;  %v2256_v42 = vor.u32 %v3177_v30, %v2253_v31 }
  0x2c   :  { %511 = vmatpush.bf16.msra.mxu0 %v2156_v6  ;;  %v3206_v39 = vld [vmem:[#allocation7 + $0x1ec] sm:$0xf]  ;;  %v2373_v40 = vld [vmem:[#allocation7 + $0x1f8] sm:$0xf0]  ;;  %v2227_v43 = vld [vmem:[#allocation7 + $0xc8] sm:$0xf]  ;;  %v2372_v45 = vor.u32 %v3208_v34, %v2371_v32  ;;  %v2248_v46 = vor.u32 %v3174_v35, %v2245_v36 }
  0x2d   :  { %524 = vmatpush.bf16.msra.mxu1 %v2284_v7  ;;  %537 = vmatpush.bf16.msra.mxu2 %v2160_v10  ;;  %v3172_v44 = vld [vmem:[#allocation7 + $0xd4] sm:$0xf0]  ;;  %v2355_v47 = vld [vmem:[#allocation7 + $0x1c8] sm:$0xf]  ;;  %v2376_v48 = vor.u32 %v3206_v39, %v2373_v40  ;;  %v3170_v50 = vld [vmem:[#allocation7 + $0xcc] sm:$0xf] }
  0x2e   :  { %550 = vmatpush.bf16.msra.mxu3 %v2288_v11  ;;  %v3204_v49 = vld [vmem:[#allocation7 + $0x1d4] sm:$0xf0]  ;;  %v2229_v51 = vld [vmem:[#allocation7 + $0xd8] sm:$0xf0]  ;;  %v2228_v52 = vor.u32 %v3172_v44, %v2227_v43  ;;  %v3202_v53 = vld [vmem:[#allocation7 + $0x1cc] sm:$0xf] }
  0x2f   :  { %v2357_v54 = vld [vmem:[#allocation7 + $0x1d8] sm:$0xf0]  ;;  %v2356_v55 = vor.u32 %v3204_v49, %v2355_v47  ;;  %v2232_v56 = vor.u32 %v3170_v50, %v2229_v51  ;;  %v2211_v58 = vld [vmem:[#allocation7 + $0xa8] sm:$0xf]  ;;  %v3168_v59 = vld [vmem:[#allocation7 + $0xb4] sm:$0xf0] }
  0x30   :  { %512 = vmatpush.bf16.msra.mxu0 %v2140_v18  ;;  %v2360_v57 = vor.u32 %v3202_v53, %v2357_v54  ;;  %v2339_v60 = vld [vmem:[#allocation7 + $0x1a8] sm:$0xf]  ;;  %v2212_v61 = vor.u32 %v3168_v59, %v2211_v58  ;;  %v3200_v62 = vld [vmem:[#allocation7 + $0x1b4] sm:$0xf0]  ;;  %v3166_v63 = vld [vmem:[#allocation7 + $0xac] sm:$0xf] }
  0x31   :  { %525 = vmatpush.bf16.msra.mxu1 %v2268_v21  ;;  %538 = vmatpush.bf16.msra.mxu2 %v2144_v25  ;;  %v2213_v0 = vld [vmem:[#allocation7 + $0xb8] sm:$0xf0]  ;;  %v2340_v1 = vor.u32 %v3200_v62, %v2339_v60  ;;  %v3198_v3 = vld [vmem:[#allocation7 + $0x1ac] sm:$0xf]  ;;  %v2195_v6 = vld [vmem:[#allocation7 + $0x88] sm:$0xf] }
  0x32   :  { %551 = vmatpush.bf16.msra.mxu3 %v2272_v26  ;;  %v2216_v2 = vor.u32 %v3166_v63, %v2213_v0  ;;  %v2341_v4 = vld [vmem:[#allocation7 + $0x1b8] sm:$0xf0]  ;;  %v3164_v7 = vld [vmem:[#allocation7 + $0x94] sm:$0xf0]  ;;  %v2323_v8 = vld [vmem:[#allocation7 + $0x188] sm:$0xf] }
  0x33   :  { %v2344_v5 = vor.u32 %v3198_v3, %v2341_v4  ;;  %v2196_v9 = vor.u32 %v3164_v7, %v2195_v6  ;;  %v3196_v10 = vld [vmem:[#allocation7 + $0x194] sm:$0xf0]  ;;  %v3162_v11 = vld [vmem:[#allocation7 + $0x8c] sm:$0xf]  ;;  %v2197_v12 = vld [vmem:[#allocation7 + $0x98] sm:$0xf0] }
  0x34   :  { %513 = vmatpush.bf16.msra.mxu0 %v2124_v33  ;;  %v2324_v13 = vor.u32 %v3196_v10, %v2323_v8  ;;  %v2200_v14 = vor.u32 %v3162_v11, %v2197_v12  ;;  %v3194_v15 = vld [vmem:[#allocation7 + $0x18c] sm:$0xf]  ;;  %v2325_v16 = vld [vmem:[#allocation7 + $0x198] sm:$0xf0]  ;;  %v2179_v18 = vld [vmem:[#allocation7 + $0x68] sm:$0xf] }
  0x35   :  { %526 = vmatpush.bf16.msra.mxu1 %v2252_v37  ;;  %539 = vmatpush.bf16.msra.mxu2 %v2128_v41  ;;  %v2328_v17 = vor.u32 %v3194_v15, %v2325_v16  ;;  %v3160_v19 = vld [vmem:[#allocation7 + $0x74] sm:$0xf0]  ;;  %v2307_v20 = vld [vmem:[#allocation7 + $0x168] sm:$0xf]  ;;  %v3158_v23 = vld [vmem:[#allocation7 + $0x6c] sm:$0xf] }
  0x36   :  { %552 = vmatpush.bf16.msra.mxu3 %v2256_v42  ;;  %v2180_v21 = vor.u32 %v3160_v19, %v2179_v18  ;;  %v3192_v22 = vld [vmem:[#allocation7 + $0x174] sm:$0xf0]  ;;  %v2181_v24 = vld [vmem:[#allocation7 + $0x78] sm:$0xf0]  ;;  %v3190_v27 = vld [vmem:[#allocation7 + $0x16c] sm:$0xf] }
  0x37   :  { %v2308_v25 = vor.u32 %v3192_v22, %v2307_v20  ;;  %v2184_v26 = vor.u32 %v3158_v23, %v2181_v24  ;;  %v2309_v28 = vld [vmem:[#allocation7 + $0x178] sm:$0xf0]  ;;  %v2163_v29 = vld [vmem:[#allocation7 + $0x48] sm:$0xf]  ;;  %v3156_v31 = vld [vmem:[#allocation7 + $0x54] sm:$0xf0] }
  0x38   :  { %558 = vmatpush.bf16.msrb.mxu0 %v2244_v38  ;;  %v2312_v30 = vor.u32 %v3190_v27, %v2309_v28  ;;  %v2291_v32 = vld [vmem:[#allocation7 + $0x148] sm:$0xf]  ;;  %v3188_v33 = vld [vmem:[#allocation7 + $0x154] sm:$0xf0]  ;;  %v2164_v34 = vor.u32 %v3156_v31, %v2163_v29  ;;  %v3154_v36 = vld [vmem:[#allocation7 + $0x4c] sm:$0xf] }
  0x39   :  { %571 = vmatpush.bf16.msrb.mxu1 %v2372_v45  ;;  %584 = vmatpush.bf16.msrb.mxu2 %v2248_v46  ;;  %v2292_v35 = vor.u32 %v3188_v33, %v2291_v32  ;;  %v2165_v37 = vld [vmem:[#allocation7 + $0x58] sm:$0xf0]  ;;  %v3186_v38 = vld [vmem:[#allocation7 + $0x14c] sm:$0xf]  ;;  %v2147_v41 = vld [vmem:[#allocation7 + $0x28] sm:$0xf] }
  0x3a   :  { %597 = vmatpush.bf16.msrb.mxu3 %v2376_v48  ;;  %v2168_v39 = vor.u32 %v3154_v36, %v2165_v37  ;;  %v2293_v40 = vld [vmem:[#allocation7 + $0x158] sm:$0xf0]  ;;  %v3152_v42 = vld [vmem:[#allocation7 + $0x34] sm:$0xf0]  ;;  %v2275_v44 = vld [vmem:[#allocation7 + $0x128] sm:$0xf] }
  0x3b   :  { %v2296_v43 = vor.u32 %v3186_v38, %v2293_v40  ;;  %v3184_v45 = vld [vmem:[#allocation7 + $0x134] sm:$0xf0]  ;;  %v3150_v46 = vld [vmem:[#allocation7 + $0x2c] sm:$0xf]  ;;  %v2148_v47 = vor.u32 %v3152_v42, %v2147_v41  ;;  %v2149_v48 = vld [vmem:[#allocation7 + $0x38] sm:$0xf0] }
  0x3c   :  { %559 = vmatpush.bf16.msrb.mxu0 %v2228_v52  ;;  %v3182_v49 = vld [vmem:[#allocation7 + $0x12c] sm:$0xf]  ;;  %v2277_v50 = vld [vmem:[#allocation7 + $0x138] sm:$0xf0]  ;;  %v2276_v51 = vor.u32 %v3184_v45, %v2275_v44  ;;  %v2152_v52 = vor.u32 %v3150_v46, %v2149_v48  ;;  %v2131_v53 = vld [vmem:[#allocation7 + $0x8] sm:$0xf] }
  0x3d   :  { %572 = vmatpush.bf16.msrb.mxu1 %v2356_v55  ;;  %585 = vmatpush.bf16.msrb.mxu2 %v2232_v56  ;;  %v3148_v54 = vld [vmem:[#allocation7 + $0x14] sm:$0xf0]  ;;  %v2259_v55 = vld [vmem:[#allocation7 + $0x108] sm:$0xf]  ;;  %v2280_v56 = vor.u32 %v3182_v49, %v2277_v50  ;;  %v3146_v58 = vld [vmem:[#allocation7 + $0xc] sm:$0xf] }
  0x3e   :  { %598 = vmatpush.bf16.msrb.mxu3 %v2360_v57  ;;  %v3180_v57 = vld [vmem:[#allocation7 + $0x114] sm:$0xf0]  ;;  %v2133_v59 = vld [vmem:[#allocation7 + $0x18] sm:$0xf0]  ;;  %v3178_v60 = vld [vmem:[#allocation7 + $0x10c] sm:$0xf]  ;;  %v2132_v62 = vor.u32 %v3148_v54, %v2131_v53 }
  0x3f   :  { %v2260_v63 = vor.u32 %v3180_v57, %v2259_v55  ;;  %v2136_v0 = vor.u32 %v3146_v58, %v2133_v59  ;;  %v100_v3 = vld [vmem:[#allocation5] sm:$0x3]  ;;  %v2739_v15 = vld [vmem:[#allocation8 + $0x2d0] sm:$0xf]  ;;  %v3302_v16 = vld [vmem:[#allocation8 + $0x2e4] sm:$0xf0] }
  0x40   :  { %560 = vmatpush.bf16.msrb.mxu0 %v2212_v61  ;;  %v2261_v61 = vld [vmem:[#allocation7 + $0x118] sm:$0xf0]  ;;  %v102_v6 = vperm.slane %v100_v3, 0  ;;  %v103_v7 = vperm.slane %v100_v3, 1  ;;  %v3350_v18 = vld [vmem:[#allocation8 + $0x464] sm:$0xf0]  ;;  %v2740_v28 = vor.u32 %v3302_v16, %v2739_v15 }
  0x41   :  { %573 = vmatpush.bf16.msrb.mxu1 %v2340_v1  ;;  %586 = vmatpush.bf16.msrb.mxu2 %v2216_v2  ;;  %v2264_v1 = vor.u32 %v3178_v60, %v2261_v61  ;;  %v87_v2 = vld [vmem:[#allocation2] sm:$0x3]  ;;  %v3398_v22 = vld [vmem:[#allocation8 + $0x5e4] sm:$0xf0]  ;;  %v3248_v27 = vld [vmem:[#allocation8 + $0x134] sm:$0xf0] }
  0x42   :  { %599 = vmatpush.bf16.msrb.mxu3 %v2344_v5  ;;  %v94_v4 = vperm.slane %v87_v2, 0  ;;  %v95_v5 = vperm.slane %v87_v2, 1  ;;  %v2715_v29 = vld [vmem:[#allocation8 + $0x2a0] sm:$0xf]  ;;  %v3392_v36 = vld [vmem:[#allocation8 + $0x5b4] sm:$0xf0] }
  0x43   :  { %v2907_v32 = vld [vmem:[#allocation8 + $0x420] sm:$0xf]  ;;  %v2499_v38 = vld [vmem:[#allocation8 + $0xf0] sm:$0xf]  ;;  %v3290_v42 = vld [vmem:[#allocation8 + $0x284] sm:$0xf0] }
  0x44   :  { %561 = vmatpush.bf16.msrb.mxu0 %v2196_v9  ;;  %v2691_v41 = vld [vmem:[#allocation8 + $0x270] sm:$0xf]  ;;  %v3338_v46 = vld [vmem:[#allocation8 + $0x404] sm:$0xf0]  ;;  %v2475_v50 = vld [vmem:[#allocation8 + $0xc0] sm:$0xf] }
  0x45   :  { %574 = vmatpush.bf16.msrb.mxu1 %v2324_v13  ;;  %587 = vmatpush.bf16.msrb.mxu2 %v2200_v14  ;;  %v2547_v13 = vld [vmem:[#allocation8 + $0x150] sm:$0xf]  ;;  %v3254_v14 = vld [vmem:[#allocation8 + $0x164] sm:$0xf0]  ;;  %v2667_v53 = vld [vmem:[#allocation8 + $0x240] sm:$0xf] }
  0x46   :  { %600 = vmatpush.bf16.msrb.mxu3 %v2328_v17  ;;  %v2931_v17 = vld [vmem:[#allocation8 + $0x450] sm:$0xf]  ;;  %v3386_v48 = vld [vmem:[#allocation8 + $0x584] sm:$0xf0]  ;;  %v3284_v54 = vld [vmem:[#allocation8 + $0x254] sm:$0xf0] }
  0x47   :  { %v2932_v31 = vor.u32 %v3350_v18, %v2931_v17  ;;  %v2883_v44 = vld [vmem:[#allocation8 + $0x3f0] sm:$0xf]  ;;  %v3332_v58 = vld [vmem:[#allocation8 + $0x3d4] sm:$0xf0]  ;;  %v3051_v59 = vld [vmem:[#allocation8 + $0x540] sm:$0xf] }
  0x48   :  { %562 = vmatpush.bf16.msrb.mxu0 %v2180_v21  ;;  %v3123_v21 = vld [vmem:[#allocation8 + $0x5d0] sm:$0xf]  ;;  %v2884_v55 = vor.u32 %v3338_v46, %v2883_v44  ;;  %v3380_v60 = vld [vmem:[#allocation8 + $0x554] sm:$0xf0]  ;;  %v3278_v2 = vld [vmem:[#allocation8 + $0x224] sm:$0xf0] }
  0x49   :  { %575 = vmatpush.bf16.msrb.mxu1 %v2308_v25  ;;  %588 = vmatpush.bf16.msrb.mxu2 %v2184_v26  ;;  %v2548_v25 = vor.u32 %v3254_v14, %v2547_v13  ;;  %v2523_v26 = vld [vmem:[#allocation8 + $0x120] sm:$0xf]  ;;  %v3124_v33 = vor.u32 %v3398_v22, %v3123_v21  ;;  %v3272_v14 = vld [vmem:[#allocation8 + $0x1f4] sm:$0xf0]  ;;  %v2403_v22 = vld [vmem:[#allocation8 + $0x30] sm:$0xf] }
  0x4a   :  { %601 = vmatpush.bf16.msrb.mxu3 %v2312_v30  ;;  %v3296_v30 = vld [vmem:[#allocation8 + $0x2b4] sm:$0xf0]  ;;  %v2524_v37 = vor.u32 %v3248_v27, %v2523_v26  ;;  %v2619_v13 = vld [vmem:[#allocation8 + $0x1e0] sm:$0xf]  ;;  %v2595_v27 = vld [vmem:[#allocation8 + $0x1b0] sm:$0xf] }
  0x4b   :  { %v2716_v40 = vor.u32 %v3296_v30, %v2715_v29  ;;  %v2811_v16 = vld [vmem:[#allocation8 + $0x360] sm:$0xf]  ;;  %v3320_v18 = vld [vmem:[#allocation8 + $0x374] sm:$0xf0]  ;;  %v2620_v26 = vor.u32 %v3272_v14, %v2619_v13  ;;  %v2787_v30 = vld [vmem:[#allocation8 + $0x330] sm:$0xf] }
  0x4c   :  { %563 = vmatpush.bf16.msrb.mxu0 %v2164_v34  ;;  %v3344_v34 = vld [vmem:[#allocation8 + $0x434] sm:$0xf0]  ;;  %v2812_v29 = vor.u32 %v3320_v18, %v2811_v16  ;;  %v2741_v44 = vld [vmem:[#allocation8 + $0x2e8] sm:$0xf0]  ;;  %v2429_v13 = vld [vmem:[#allocation8 + $0x78] sm:$0xf0] }
  0x4d   :  { %576 = vmatpush.bf16.msrb.mxu1 %v2292_v35  ;;  %589 = vmatpush.bf16.msrb.mxu2 %v2168_v39  ;;  %v3099_v35 = vld [vmem:[#allocation8 + $0x5a0] sm:$0xf]  ;;  %v3242_v39 = vld [vmem:[#allocation8 + $0x104] sm:$0xf0]  ;;  %v3308_v46 = vld [vmem:[#allocation8 + $0x314] sm:$0xf0] }
  0x4e   :  { %602 = vmatpush.bf16.msrb.mxu3 %v2296_v43  ;;  %v2908_v43 = vor.u32 %v3344_v34, %v2907_v32  ;;  %v3100_v45 = vor.u32 %v3392_v36, %v3099_v35  ;;  %v2500_v49 = vor.u32 %v3242_v39, %v2499_v38  ;;  %v3314_v32 = vld [vmem:[#allocation8 + $0x344] sm:$0xf0]  ;;  %v3212_v35 = vld [vmem:[#allocation8 + $0x14] sm:$0xf0]  ;;  %v2571_v38 = vld [vmem:[#allocation8 + $0x180] sm:$0xf] }
  0x4f   :  { %v3362_v34 = vld [vmem:[#allocation8 + $0x4c4] sm:$0xf0]  ;;  %v3260_v39 = vld [vmem:[#allocation8 + $0x194] sm:$0xf0]  ;;  %v3341_v14 = vld [vmem:[#allocation8 + $0x424] sm:$0xf] }
  0x50   :  { %564 = vmatpush.bf16.msrb.mxu0 %v2148_v47  ;;  %v3075_v47 = vld [vmem:[#allocation8 + $0x570] sm:$0xf]  ;;  %v2909_v16 = vld [vmem:[#allocation8 + $0x438] sm:$0xf0]  ;;  %v3356_v18 = vld [vmem:[#allocation8 + $0x494] sm:$0xf0] }
  0x51   :  { %577 = vmatpush.bf16.msrb.mxu1 %v2276_v51  ;;  %590 = vmatpush.bf16.msrb.mxu2 %v2152_v52  ;;  %v3236_v51 = vld [vmem:[#allocation8 + $0xd4] sm:$0xf0]  ;;  %v2692_v52 = vor.u32 %v3290_v42, %v2691_v41  ;;  %v3076_v57 = vor.u32 %v3386_v48, %v3075_v47  ;;  %v2549_v42 = vld [vmem:[#allocation8 + $0x168] sm:$0xf0]  ;;  %v2572_v48 = vor.u32 %v3260_v39, %v2571_v38  ;;  %v3209_v39 = vld [vmem:[#allocation8 + $0x4] sm:$0xf] }
  0x52   :  { %603 = vmatpush.bf16.msrb.mxu3 %v2280_v56  ;;  %v2859_v56 = vld [vmem:[#allocation8 + $0x3c0] sm:$0xf]  ;;  %v2476_v61 = vor.u32 %v3236_v51, %v2475_v50  ;;  %v2933_v50 = vld [vmem:[#allocation8 + $0x468] sm:$0xf0]  ;;  %s2109_s28 = sshll.u32 %s3679_s7, 4  ;;  %s2110_s28 = int_to_ptr.hbm [resolvable:$true] %s2109_s28 }
  0x53   :  { %v2860_v3 = vor.u32 %v3332_v58, %v2859_v56  ;;  %v2717_v56 = vld [vmem:[#allocation8 + $0x2b8] sm:$0xf0] }
  0x54   :  { %565 = vmatpush.bf16.msrb.mxu0 %v2132_v62  ;;  %v2451_v62 = vld [vmem:[#allocation8 + $0x90] sm:$0xf] }
  0x55   :  { %578 = vmatpush.bf16.msrb.mxu1 %v2260_v63  ;;  %591 = vmatpush.bf16.msrb.mxu2 %v2136_v0  ;;  %v3230_v63 = vld [vmem:[#allocation8 + $0xa4] sm:$0xf0]  ;;  %v2668_v0 = vor.u32 %v3284_v54, %v2667_v53  ;;  %v2525_v54 = vld [vmem:[#allocation8 + $0x138] sm:$0xf0] }
  0x56   :  { %604 = vmatpush.bf16.msrb.mxu3 %v2264_v1  ;;  %v2643_v1 = vld [vmem:[#allocation8 + $0x210] sm:$0xf] }
  0x88   :  { %v91_v8 = vpop.permute.xlu0 %90 }
  0x89   :  { %v98_v9 = vmul.f32 %v94_v4, %v91_v8  ;;  %v99_v10 = vmul.f32 %v95_v5, %v91_v8  ;;  %v2835_v4 = vld [vmem:[#allocation8 + $0x390] sm:$0xf]  ;;  %v3052_v5 = vor.u32 %v3380_v60, %v3051_v59  ;;  %v3374_v8 = vld [vmem:[#allocation8 + $0x524] sm:$0xf0]  ;;  %v3239_v60 = vld [vmem:[#allocation8 + $0xf4] sm:$0xf] }
  0x8b   :  { %v106_v11 = vadd.f32 %v102_v6, %v98_v9  ;;  %v107_v12 = vadd.f32 %v103_v7, %v99_v10  ;;  %v3326_v6 = vld [vmem:[#allocation8 + $0x3a4] sm:$0xf0]  ;;  %v3027_v7 = vld [vmem:[#allocation8 + $0x510] sm:$0xf]  ;;  %v2452_v9 = vor.u32 %v3230_v63, %v2451_v62  ;;  %v2427_v10 = vld [vmem:[#allocation8 + $0x60] sm:$0xf] }
  0x8c   :  { %v2836_v15 = vor.u32 %v3326_v6, %v2835_v4  ;;  %v3028_v17 = vor.u32 %v3374_v8, %v3027_v7  ;;  %v2501_v62 = vld [vmem:[#allocation8 + $0x108] sm:$0xf0]  ;;  %v3287_v63 = vld [vmem:[#allocation8 + $0x274] sm:$0xf]  ;;  %v2477_v4 = vld [vmem:[#allocation8 + $0xd8] sm:$0xf0] }
  0x8d   :  { %v108_v19 = vmax.f32 %v106_v11, 0.0  ;;  %v109_v20 = vmax.f32 %v107_v12, 0.0  ;;  %v3224_v11 = vld [vmem:[#allocation8 + $0x74] sm:$0xf0]  ;;  %v2644_v12 = vor.u32 %v3278_v2, %v2643_v1  ;;  %v2504_v1 = vor.u32 %v3239_v60, %v2501_v62  ;;  %v3233_v2 = vld [vmem:[#allocation8 + $0xc4] sm:$0xf] }
  0x8e   :  { %v2428_v21 = vor.u32 %v3224_v11, %v2427_v10  ;;  %v2669_v6 = vld [vmem:[#allocation8 + $0x258] sm:$0xf0]  ;;  %v2480_v7 = vor.u32 %v3233_v2, %v2477_v4  ;;  %v2453_v10 = vld [vmem:[#allocation8 + $0xa8] sm:$0xf0]  ;;  %v3317_v60 = vld [vmem:[#allocation8 + $0x364] sm:$0xf] }
  0x8f   :  { %v3605_v23 = vpack.c.bf16 %v108_v19, %v108_v19  ;;  %v3607_v24 = vpack.c.bf16 %v109_v20, %v109_v20  ;;  %v3003_v19 = vld [vmem:[#allocation8 + $0x4e0] sm:$0xf]  ;;  %v3368_v20 = vld [vmem:[#allocation8 + $0x4f4] sm:$0xf0]  ;;  %v3311_v2 = vld [vmem:[#allocation8 + $0x334] sm:$0xf] }
  0x91   :  { %514 = vmatmul.bf16.vlgmr.msra.gmra.mxu0 %v3605_v23  ;;  %527 = vmatmul.bf16.vlgmr.msra.gmra.mxu1 %v3607_v24 }
  0x92   :  { %540 = vmatmul.bf16.vlgmr.msra.gmra.mxu2 %v3605_v23  ;;  %553 = vmatmul.bf16.vlgmr.msra.gmra.mxu3 %v3607_v24 }
  0x93   :  { %1784 = vmatpush.bf16.msra.mxu0 %v2548_v25  ;;  %1797 = vmatpush.bf16.msra.mxu1 %v2740_v28  ;;  %v3218_v25 = vld [vmem:[#allocation8 + $0x44] sm:$0xf0] }
  0x94   :  { %1810 = vmatpush.bf16.msra.mxu2 %v2932_v31  ;;  %1823 = vmatpush.bf16.msra.mxu3 %v3124_v33  ;;  %v3266_v28 = vld [vmem:[#allocation8 + $0x1c4] sm:$0xf0]  ;;  %v3004_v31 = vor.u32 %v3368_v20, %v3003_v19  ;;  %v2979_v33 = vld [vmem:[#allocation8 + $0x4b0] sm:$0xf]  ;;  %v2912_v19 = vor.u32 %v3341_v14, %v2909_v16  ;;  %v3353_v16 = vld [vmem:[#allocation8 + $0x484] sm:$0xf] }
  0x95   :  { %v2596_v36 = vor.u32 %v3266_v28, %v2595_v27  ;;  %v2980_v41 = vor.u32 %v3362_v34, %v2979_v33  ;;  %v3125_v27 = vld [vmem:[#allocation8 + $0x5e8] sm:$0xf0] }
  0x96   :  { %v2885_v33 = vld [vmem:[#allocation8 + $0x408] sm:$0xf0] }
  0x97   :  { %1785 = vmatpush.bf16.msra.mxu0 %v2524_v37  ;;  %1798 = vmatpush.bf16.msra.mxu1 %v2716_v40  ;;  %v3251_v37 = vld [vmem:[#allocation8 + $0x154] sm:$0xf]  ;;  %v2788_v40 = vor.u32 %v3314_v32, %v2787_v30  ;;  %v2405_v30 = vld [vmem:[#allocation8 + $0x48] sm:$0xf0] }
  0x98   :  { %1811 = vmatpush.bf16.msra.mxu2 %v2908_v43  ;;  %1824 = vmatpush.bf16.msra.mxu3 %v3100_v45  ;;  %v3299_v43 = vld [vmem:[#allocation8 + $0x2d4] sm:$0xf]  ;;  %v2763_v45 = vld [vmem:[#allocation8 + $0x300] sm:$0xf]  ;;  %v2552_v51 = vor.u32 %v3251_v37, %v2549_v42  ;;  %v3101_v37 = vld [vmem:[#allocation8 + $0x5b8] sm:$0xf0] }
  0x99   :  { %v2744_v53 = vor.u32 %v3299_v43, %v2741_v44  ;;  %v3329_v42 = vld [vmem:[#allocation8 + $0x3c4] sm:$0xf]  ;;  %v2861_v43 = vld [vmem:[#allocation8 + $0x3d8] sm:$0xf0] }
  0x9a   :  { %v2864_v44 = vor.u32 %v3329_v42, %v2861_v43 }
  0x9b   :  { %1786 = vmatpush.bf16.msra.mxu0 %v2500_v49  ;;  %1799 = vmatpush.bf16.msra.mxu1 %v2692_v52  ;;  %v3347_v49 = vld [vmem:[#allocation8 + $0x454] sm:$0xf]  ;;  %v3245_v52 = vld [vmem:[#allocation8 + $0x124] sm:$0xf] }
  0x9c   :  { %1812 = vmatpush.bf16.msra.mxu2 %v2884_v55  ;;  %1825 = vmatpush.bf16.msra.mxu3 %v3076_v57  ;;  %v3293_v55 = vld [vmem:[#allocation8 + $0x2a4] sm:$0xf]  ;;  %v2764_v57 = vor.u32 %v3308_v46, %v2763_v45  ;;  %v2936_v58 = vor.u32 %v3347_v49, %v2933_v50  ;;  %v2528_v59 = vor.u32 %v3245_v52, %v2525_v54  ;;  %v3263_v45 = vld [vmem:[#allocation8 + $0x1b4] sm:$0xf]  ;;  %v2597_v46 = vld [vmem:[#allocation8 + $0x1c8] sm:$0xf0] }
  0x9d   :  { %v3077_v49 = vld [vmem:[#allocation8 + $0x588] sm:$0xf0]  ;;  %v3257_v54 = vld [vmem:[#allocation8 + $0x184] sm:$0xf] }
  0x9e   :  { %v2837_v52 = vld [vmem:[#allocation8 + $0x3a8] sm:$0xf0] }
  0x9f   :  { %1787 = vmatpush.bf16.msra.mxu0 %v2476_v61  ;;  %1800 = vmatpush.bf16.msra.mxu1 %v2668_v0  ;;  %v2720_v61 = vor.u32 %v3293_v55, %v2717_v56  ;;  %v2693_v0 = vld [vmem:[#allocation8 + $0x288] sm:$0xf0]  ;;  %v2573_v55 = vld [vmem:[#allocation8 + $0x198] sm:$0xf0]  ;;  %v3377_v56 = vld [vmem:[#allocation8 + $0x544] sm:$0xf] }
  0xa0   :  { %1813 = vmatpush.bf16.msra.mxu2 %v2860_v3  ;;  %1826 = vmatpush.bf16.msra.mxu3 %v3052_v5  ;;  %v2696_v3 = vor.u32 %v3287_v63, %v2693_v0  ;;  %v3281_v5 = vld [vmem:[#allocation8 + $0x244] sm:$0xf]  ;;  %v3371_v63 = vld [vmem:[#allocation8 + $0x514] sm:$0xf]  ;;  %v3029_v0 = vld [vmem:[#allocation8 + $0x528] sm:$0xf0] }
  0xa1   :  { %566 = vmatmul.bf16.vlgmr.msrb.gmra.mxu0 %v3605_v23  ;;  %579 = vmatmul.bf16.vlgmr.msrb.gmra.mxu1 %v3607_v24  ;;  %v2672_v8 = vor.u32 %v3281_v5, %v2669_v6  ;;  %v3365_v5 = vld [vmem:[#allocation8 + $0x4e4] sm:$0xf]  ;;  %v3005_v6 = vld [vmem:[#allocation8 + $0x4f8] sm:$0xf0] }
  0xa2   :  { %592 = vmatmul.bf16.vlgmr.msrb.gmra.mxu2 %v3605_v23  ;;  %605 = vmatmul.bf16.vlgmr.msrb.gmra.mxu3 %v3607_v24  ;;  %v2404_v23 = vor.u32 %v3218_v25, %v2403_v22  ;;  %v2379_v24 = vld [vmem:[#allocation8] sm:$0xf]  ;;  %v2645_v22 = vld [vmem:[#allocation8 + $0x228] sm:$0xf0]  ;;  %v3395_v25 = vld [vmem:[#allocation8 + $0x5d4] sm:$0xf] }
  0xa3   :  { %1788 = vmatpush.bf16.msra.mxu0 %v2452_v9  ;;  %1801 = vmatpush.bf16.msra.mxu1 %v2644_v12  ;;  %v2380_v47 = vor.u32 %v3212_v35, %v2379_v24  ;;  %v3227_v9 = vld [vmem:[#allocation8 + $0x94] sm:$0xf]  ;;  %v3221_v12 = vld [vmem:[#allocation8 + $0x64] sm:$0xf]  ;;  %v3128_v28 = vor.u32 %v3395_v25, %v3125_v27  ;;  %v2621_v24 = vld [vmem:[#allocation8 + $0x1f8] sm:$0xf0] }
  0xa4   :  { %1814 = vmatpush.bf16.msra.mxu2 %v2836_v15  ;;  %1827 = vmatpush.bf16.msra.mxu3 %v3028_v17  ;;  %v2456_v11 = vor.u32 %v3227_v9, %v2453_v10  ;;  %v2432_v15 = vor.u32 %v3221_v12, %v2429_v13  ;;  %v2955_v17 = vld [vmem:[#allocation8 + $0x480] sm:$0xf]  ;;  %v3389_v35 = vld [vmem:[#allocation8 + $0x5a4] sm:$0xf]  ;;  %v2765_v9 = vld [vmem:[#allocation8 + $0x318] sm:$0xf0] }
  0xa5   :  { %v2956_v20 = vor.u32 %v3356_v18, %v2955_v17  ;;  %v3104_v38 = vor.u32 %v3389_v35, %v3101_v37  ;;  %v2981_v12 = vld [vmem:[#allocation8 + $0x4c8] sm:$0xf0]  ;;  %v3620_v13 = vld [vmem:[%s3676_s4] sm:$0xf]  ;;  %v2555_v25 = vld [vmem:[#allocation8 + $0x158] sm:$0xf] }
  0xa6   :  { %v2957_v17 = vld [vmem:[#allocation8 + $0x498] sm:$0xf0]  ;;  %v179_v27 = vperm.slane %v3620_v13, 1 }
  0xa7   :  { %1789 = vmatpush.bf16.msra.mxu0 %v2428_v21  ;;  %1802 = vmatpush.bf16.msra.mxu1 %v2620_v26  ;;  %v3275_v21 = vld [vmem:[#allocation8 + $0x214] sm:$0xf]  ;;  %v2960_v18 = vor.u32 %v3353_v16, %v2957_v17  ;;  %v3225_v17 = vld [vmem:[#allocation8 + $0x7c] sm:$0xf0] }
  0xa8   :  { %1815 = vmatpush.bf16.msra.mxu2 %v2812_v29  ;;  %1828 = vmatpush.bf16.msra.mxu3 %v3004_v31  ;;  %v2648_v26 = vor.u32 %v3275_v21, %v2645_v22  ;;  %v3215_v29 = vld [vmem:[#allocation8 + $0x34] sm:$0xf] }
  0xa9   :  { %v3335_v31 = vld [vmem:[#allocation8 + $0x3f4] sm:$0xf]  ;;  %v2408_v32 = vor.u32 %v3215_v29, %v2405_v30 }
  0xaa   :  { %v2888_v34 = vor.u32 %v3335_v31, %v2885_v33  ;;  %v2531_v33 = vld [vmem:[#allocation8 + $0x128] sm:$0xf] }
  0xab   :  { %1790 = vmatpush.bf16.msra.mxu0 %v2404_v23  ;;  %1803 = vmatpush.bf16.msra.mxu1 %v2596_v36  ;;  %v3269_v23 = vld [vmem:[#allocation8 + $0x1e4] sm:$0xf] }
  0xac   :  { %1816 = vmatpush.bf16.msra.mxu2 %v2788_v40  ;;  %1829 = vmatpush.bf16.msra.mxu3 %v2980_v41  ;;  %v2624_v36 = vor.u32 %v3269_v23, %v2621_v24  ;;  %v2381_v40 = vld [vmem:[#allocation8 + $0x18] sm:$0xf0] }
  0xad   :  { %v2384_v41 = vor.u32 %v3209_v39, %v2381_v40  ;;  %v3303_v39 = vld [vmem:[#allocation8 + $0x2ec] sm:$0xf0]  ;;  %v2507_v40 = vld [vmem:[#allocation8 + $0xf8] sm:$0xf] }
  0xaf   :  { %1791 = vmatpush.bf16.msra.mxu0 %v2380_v47  ;;  %1804 = vmatpush.bf16.msra.mxu1 %v2572_v48  ;;  %v2600_v47 = vor.u32 %v3263_v45, %v2597_v46  ;;  %v3383_v48 = vld [vmem:[#allocation8 + $0x574] sm:$0xf] }
  0xb0   :  { %1817 = vmatpush.bf16.msra.mxu2 %v2764_v57  ;;  %1830 = vmatpush.bf16.msra.mxu3 %v2956_v20  ;;  %v3080_v50 = vor.u32 %v3383_v48, %v3077_v49  ;;  %v2576_v57 = vor.u32 %v3257_v54, %v2573_v55  ;;  %v3297_v48 = vld [vmem:[#allocation8 + $0x2bc] sm:$0xf0] }
  0xb3   :  { %1836 = vmatpush.bf16.msrb.mxu0 %v2552_v51  ;;  %1849 = vmatpush.bf16.msrb.mxu1 %v2744_v53  ;;  %v3323_v51 = vld [vmem:[#allocation8 + $0x394] sm:$0xf] }
  0xb4   :  { %1862 = vmatpush.bf16.msrb.mxu2 %v2936_v58  ;;  %1875 = vmatpush.bf16.msrb.mxu3 %v3128_v28  ;;  %v2840_v53 = vor.u32 %v3323_v51, %v2837_v52  ;;  %v3053_v58 = vld [vmem:[#allocation8 + $0x558] sm:$0xf0]  ;;  %v2483_v51 = vld [vmem:[#allocation8 + $0xc8] sm:$0xf]  ;;  %v3237_v52 = vld [vmem:[#allocation8 + $0xdc] sm:$0xf0] }
  0xb7   :  { %1837 = vmatpush.bf16.msrb.mxu0 %v2528_v59  ;;  %1850 = vmatpush.bf16.msrb.mxu1 %v2720_v61  ;;  %v3056_v59 = vor.u32 %v3377_v56, %v3053_v58  ;;  %v2813_v61 = vld [vmem:[#allocation8 + $0x378] sm:$0xf0]  ;;  %v2699_v58 = vld [vmem:[#allocation8 + $0x278] sm:$0xf] }
  0xb8   :  { %1863 = vmatpush.bf16.msrb.mxu2 %v2912_v19  ;;  %1876 = vmatpush.bf16.msrb.mxu3 %v3104_v38  ;;  %v2816_v62 = vor.u32 %v3317_v60, %v2813_v61  ;;  %v2747_v38 = vld [vmem:[#allocation8 + $0x2d8] sm:$0xf] }
  0xb9   :  { %v2748_v43 = vor.u32 %v3303_v39, %v2747_v38  ;;  %v2939_v61 = vld [vmem:[#allocation8 + $0x458] sm:$0xf]  ;;  %v3107_v38 = vld [vmem:[#allocation8 + $0x5a8] sm:$0xf]  ;;  %v3393_v39 = vld [vmem:[#allocation8 + $0x5bc] sm:$0xf0] }
  0xbb   :  { %1838 = vmatpush.bf16.msrb.mxu0 %v2504_v1  ;;  %1851 = vmatpush.bf16.msrb.mxu1 %v2696_v3  ;;  %v3032_v1 = vor.u32 %v3371_v63, %v3029_v0  ;;  %v2789_v3 = vld [vmem:[#allocation8 + $0x348] sm:$0xf0]  ;;  %v181_v63 = vperm.slane %v3620_v13, 3  ;;  %v2459_v0 = vld [vmem:[#allocation8 + $0x98] sm:$0xf] }
  0xbc   :  { %1864 = vmatpush.bf16.msrb.mxu2 %v2888_v34  ;;  %1877 = vmatpush.bf16.msrb.mxu3 %v3080_v50  ;;  %v2792_v4 = vor.u32 %v3311_v2, %v2789_v3  ;;  %v3249_v34 = vld [vmem:[#allocation8 + $0x13c] sm:$0xf0] }
  0xbd   :  { %v2532_v37 = vor.u32 %v3249_v34, %v2531_v33  ;;  %v3219_v33 = vld [vmem:[#allocation8 + $0x4c] sm:$0xf0] }
  0xbf   :  { %1839 = vmatpush.bf16.msrb.mxu0 %v2480_v7  ;;  %1852 = vmatpush.bf16.msrb.mxu1 %v2672_v8  ;;  %v3008_v7 = vor.u32 %v3365_v5, %v3005_v6  ;;  %v3305_v8 = vld [vmem:[#allocation8 + $0x304] sm:$0xf]  ;;  %v2675_v5 = vld [vmem:[#allocation8 + $0x248] sm:$0xf]  ;;  %v3285_v6 = vld [vmem:[#allocation8 + $0x25c] sm:$0xf0] }
  0xc0   :  { %1865 = vmatpush.bf16.msrb.mxu2 %v2864_v44  ;;  %1878 = vmatpush.bf16.msrb.mxu3 %v3056_v59  ;;  %v2768_v10 = vor.u32 %v3305_v8, %v2765_v9  ;;  %v180_v44 = vperm.slane %v3620_v13, 2  ;;  %v3291_v59 = vld [vmem:[#allocation8 + $0x28c] sm:$0xf0] }
  0xc1   :  { %v2700_v3 = vor.u32 %v3291_v59, %v2699_v58  ;;  %v2843_v59 = vld [vmem:[#allocation8 + $0x398] sm:$0xf] }
  0xc3   :  { %1840 = vmatpush.bf16.msrb.mxu0 %v2456_v11  ;;  %1853 = vmatpush.bf16.msrb.mxu1 %v2648_v26  ;;  %v3359_v11 = vld [vmem:[#allocation8 + $0x4b4] sm:$0xf]  ;;  %v3255_v26 = vld [vmem:[#allocation8 + $0x16c] sm:$0xf0] }
  0xc4   :  { %1866 = vmatpush.bf16.msrb.mxu2 %v2840_v53  ;;  %1879 = vmatpush.bf16.msrb.mxu3 %v3032_v1  ;;  %v2984_v14 = vor.u32 %v3359_v11, %v2981_v12  ;;  %v2556_v29 = vor.u32 %v3255_v26, %v2555_v25  ;;  %v3231_v1 = vld [vmem:[#allocation8 + $0xac] sm:$0xf0]  ;;  %v2915_v11 = vld [vmem:[#allocation8 + $0x428] sm:$0xf]  ;;  %v3345_v12 = vld [vmem:[#allocation8 + $0x43c] sm:$0xf0] }
  0xc5   :  { %v3131_v25 = vld [vmem:[#allocation8 + $0x5d8] sm:$0xf]  ;;  %v3399_v26 = vld [vmem:[#allocation8 + $0x5ec] sm:$0xf0] }
  0xc7   :  { %1841 = vmatpush.bf16.msrb.mxu0 %v2432_v15  ;;  %1854 = vmatpush.bf16.msrb.mxu1 %v2624_v36  ;;  %v178_v15 = vperm.slane %v3620_v13, 0  ;;  %v2435_v13 = vld [vmem:[#allocation8 + $0x68] sm:$0xf] }
  0xc8   :  { %1867 = vmatpush.bf16.msrb.mxu2 %v2816_v62  ;;  %1880 = vmatpush.bf16.msrb.mxu3 %v3008_v7  ;;  %v3351_v62 = vld [vmem:[#allocation8 + $0x46c] sm:$0xf0] }
  0xcb   :  { %1842 = vmatpush.bf16.msrb.mxu0 %v2408_v32  ;;  %1855 = vmatpush.bf16.msrb.mxu1 %v2600_v47  ;;  %v2723_v47 = vld [vmem:[#allocation8 + $0x2a8] sm:$0xf] }
  0xcc   :  { %1868 = vmatpush.bf16.msrb.mxu2 %v2792_v4  ;;  %1881 = vmatpush.bf16.msrb.mxu3 %v2984_v14  ;;  %v2724_v56 = vor.u32 %v3297_v48, %v2723_v47  ;;  %v2940_v4 = vor.u32 %v3351_v62, %v2939_v61  ;;  %v3213_v47 = vld [vmem:[#allocation8 + $0x1c] sm:$0xf0] }
  0xcf   :  { %1843 = vmatpush.bf16.msrb.mxu0 %v2384_v41  ;;  %1856 = vmatpush.bf16.msrb.mxu1 %v2576_v57  ;;  %v3243_v41 = vld [vmem:[#allocation8 + $0x10c] sm:$0xf0]  ;;  %v2484_v57 = vor.u32 %v3237_v52, %v2483_v51  ;;  %v2557_v51 = vld [vmem:[#allocation8 + $0x170] sm:$0xf0]  ;;  %v2603_v52 = vld [vmem:[#allocation8 + $0x1b8] sm:$0xf] }
  0xd0   :  { %1869 = vmatpush.bf16.msrb.mxu2 %v2768_v10  ;;  %1882 = vmatpush.bf16.msrb.mxu3 %v2960_v18  ;;  %v2508_v46 = vor.u32 %v3243_v41, %v2507_v40  ;;  %v2460_v10 = vor.u32 %v3231_v1, %v2459_v0  ;;  %v2676_v18 = vor.u32 %v3285_v6, %v2675_v5  ;;  %v2533_v0 = vld [vmem:[#allocation8 + $0x140] sm:$0xf0]  ;;  %v2579_v1 = vld [vmem:[#allocation8 + $0x188] sm:$0xf]  ;;  %v3300_v6 = vld [vmem:[#allocation8 + $0x2dc] sm:$0xf] }
 0x10e   :  { %v515_v19 = vpop.f32.mrf.mxu0  ;;  %v528_v20 = vpop.f32.mrf.mxu1 }
 0x10f   :  { %v516_v21 = vadd.f32 %v515_v19, %v178_v15  ;;  %v2651_v19 = vld [vmem:[#allocation8 + $0x218] sm:$0xf] }
 0x111   :  { %v529_v22 = vadd.f32 %v528_v20, %v516_v21  ;;  %v2916_v21 = vor.u32 %v3345_v12, %v2915_v11  ;;  %v3321_v11 = vld [vmem:[#allocation8 + $0x37c] sm:$0xf0] }
 0x113   :  { %v610_v28 = vmax.f32 %v529_v22, 0.0  ;;  %v3279_v22 = vld [vmem:[#allocation8 + $0x22c] sm:$0xf0] }
 0x114   :  { %v2652_v34 = vor.u32 %v3279_v22, %v2651_v19 }
 0x115   :  { %v3624_v30 = vpack.c.bf16 %v610_v28, %v610_v28  ;;  %v541_v31 = vpop.f32.mrf.mxu2  ;;  %v554_v32 = vpop.f32.mrf.mxu3  ;;  %v2891_v28 = vld [vmem:[#allocation8 + $0x3f8] sm:$0xf] }
 0x116   :  { %v542_v23 = vadd.f32 %v541_v31, %v179_v27  ;;  %v517_v24 = vpop.f32.mrf.mxu0  ;;  %v530_v35 = vpop.f32.mrf.mxu1  ;;  %v2436_v27 = vor.u32 %v3225_v17, %v2435_v13  ;;  %v3035_v17 = vld [vmem:[#allocation8 + $0x518] sm:$0xf] }
 0x117   :  { %1792 = vmatmul.bf16.vlgmr.msra.gmra.mxu0 %v3624_v30  ;;  %v2627_v24 = vld [vmem:[#allocation8 + $0x1e8] sm:$0xf] }
 0x118   :  { %v555_v36 = vadd.f32 %v554_v32, %v542_v23  ;;  %1888 = vmatpush.bf16.msra.mxu0 %v2556_v29  ;;  %v3339_v29 = vld [vmem:[#allocation8 + $0x40c] sm:$0xf0]  ;;  %v2411_v32 = vld [vmem:[#allocation8 + $0x38] sm:$0xf]  ;;  %v3132_v23 = vor.u32 %v3399_v26, %v3131_v25 }
 0x119   :  { %v2795_v25 = vld [vmem:[#allocation8 + $0x338] sm:$0xf]  ;;  %v3315_v26 = vld [vmem:[#allocation8 + $0x34c] sm:$0xf0] }
 0x11a   :  { %v611_v42 = vmax.f32 %v555_v36, 0.0  ;;  %v2892_v36 = vor.u32 %v3339_v29, %v2891_v28  ;;  %v3234_v28 = vld [vmem:[#allocation8 + $0xcc] sm:$0xf]  ;;  %v2485_v29 = vld [vmem:[#allocation8 + $0xe0] sm:$0xf0] }
 0x11c   :  { %v3628_v45 = vpack.c.bf16 %v611_v42, %v611_v42  ;;  %1889 = vmatpush.bf16.msra.mxu0 %v2532_v37  ;;  %v3273_v37 = vld [vmem:[#allocation8 + $0x1fc] sm:$0xf0]  ;;  %v2412_v42 = vor.u32 %v3219_v33, %v2411_v32  ;;  %v3011_v32 = vld [vmem:[#allocation8 + $0x4e8] sm:$0xf] }
 0x11d   :  { %v543_v49 = vpop.f32.mrf.mxu2  ;;  %v556_v50 = vpop.f32.mrf.mxu3  ;;  %v2628_v48 = vor.u32 %v3273_v37, %v2627_v24  ;;  %v3369_v33 = vld [vmem:[#allocation8 + $0x4fc] sm:$0xf0]  ;;  %v2701_v24 = vld [vmem:[#allocation8 + $0x290] sm:$0xf0]  ;;  %v2771_v37 = vld [vmem:[#allocation8 + $0x308] sm:$0xf] }
 0x11e   :  { %1805 = vmatmul.bf16.vlgmr.msra.gmra.mxu1 %v3628_v45  ;;  %v567_v53 = vpop.f32.mrf.mxu0  ;;  %v580_v54 = vpop.f32.mrf.mxu1  ;;  %v3108_v49 = vor.u32 %v3393_v39, %v3107_v38  ;;  %v3252_v50 = vld [vmem:[#allocation8 + $0x15c] sm:$0xf]  ;;  %v3309_v38 = vld [vmem:[#allocation8 + $0x31c] sm:$0xf0] }
 0x11f   :  { %1901 = vmatpush.bf16.msra.mxu1 %v2748_v43  ;;  %v568_v55 = vadd.f32 %v567_v53, %v180_v44  ;;  %v2867_v43 = vld [vmem:[#allocation8 + $0x3c8] sm:$0xf]  ;;  %v3333_v44 = vld [vmem:[#allocation8 + $0x3dc] sm:$0xf0]  ;;  %v2560_v58 = vor.u32 %v3252_v50, %v2557_v51  ;;  %v3228_v39 = vld [vmem:[#allocation8 + $0x9c] sm:$0xf] }
 0x120   :  { %1890 = vmatpush.bf16.msra.mxu0 %v2508_v46  ;;  %v2387_v46 = vld [vmem:[#allocation8 + $0x8] sm:$0xf]  ;;  %v2868_v53 = vor.u32 %v3333_v44, %v2867_v43  ;;  %v2941_v43 = vld [vmem:[#allocation8 + $0x470] sm:$0xf0]  ;;  %v2677_v50 = vld [vmem:[#allocation8 + $0x260] sm:$0xf0] }
 0x121   :  { %v581_v60 = vadd.f32 %v580_v54, %v568_v55  ;;  %v3267_v54 = vld [vmem:[#allocation8 + $0x1cc] sm:$0xf0]  ;;  %v3083_v55 = vld [vmem:[#allocation8 + $0x578] sm:$0xf] }
 0x122   :  { %v2604_v61 = vor.u32 %v3267_v54, %v2603_v52 }
 0x123   :  { %v612_v2 = vmax.f32 %v581_v60, 0.0  ;;  %1902 = vmatpush.bf16.msra.mxu1 %v2724_v56  ;;  %v3387_v56 = vld [vmem:[#allocation8 + $0x58c] sm:$0xf0] }
 0x124   :  { %1891 = vmatpush.bf16.msra.mxu0 %v2484_v57  ;;  %v2388_v57 = vor.u32 %v3213_v47, %v2387_v46  ;;  %v3327_v60 = vld [vmem:[#allocation8 + $0x3ac] sm:$0xf0]  ;;  %v3084_v62 = vor.u32 %v3387_v56, %v3083_v55  ;;  %v2987_v46 = vld [vmem:[#allocation8 + $0x4b8] sm:$0xf]  ;;  %v2437_v55 = vld [vmem:[#allocation8 + $0x80] sm:$0xf0] }
 0x125   :  { %v3632_v7 = vpack.c.bf16 %v612_v2, %v612_v2  ;;  %v593_v8 = vpop.f32.mrf.mxu2  ;;  %v606_v9 = vpop.f32.mrf.mxu3  ;;  %v3261_v2 = vld [vmem:[#allocation8 + $0x19c] sm:$0xf0]  ;;  %v2844_v5 = vor.u32 %v3327_v60, %v2843_v59  ;;  %v3363_v47 = vld [vmem:[#allocation8 + $0x4cc] sm:$0xf0]  ;;  %v3342_v56 = vld [vmem:[#allocation8 + $0x42c] sm:$0xf] }
 0x126   :  { %v594_v14 = vadd.f32 %v593_v8, %v181_v63  ;;  %v569_v15 = vpop.f32.mrf.mxu0  ;;  %v582_v16 = vpop.f32.mrf.mxu1  ;;  %v3246_v63 = vld [vmem:[#allocation8 + $0x12c] sm:$0xf]  ;;  %v2749_v8 = vld [vmem:[#allocation8 + $0x2f0] sm:$0xf0]  ;;  %v2580_v12 = vor.u32 %v3261_v2, %v2579_v1  ;;  %v2988_v54 = vor.u32 %v3363_v47, %v2987_v46  ;;  %v2963_v59 = vld [vmem:[#allocation8 + $0x488] sm:$0xf] }
 0x127   :  { %1903 = vmatpush.bf16.msra.mxu1 %v2700_v3  ;;  %1818 = vmatmul.bf16.vlgmr.msra.gmra.mxu2 %v3632_v7  ;;  %v3059_v3 = vld [vmem:[#allocation8 + $0x548] sm:$0xf]  ;;  %v3240_v15 = vld [vmem:[#allocation8 + $0xfc] sm:$0xf]  ;;  %v2509_v16 = vld [vmem:[#allocation8 + $0x110] sm:$0xf0]  ;;  %v2752_v13 = vor.u32 %v3300_v6, %v2749_v8 }
 0x128   :  { %v607_v20 = vadd.f32 %v606_v9, %v594_v14  ;;  %1844 = vmatmul.bf16.vlgmr.msrb.gmra.mxu0 %v3624_v30  ;;  %1914 = vmatpush.bf16.msra.mxu2 %v2940_v4  ;;  %v3381_v4 = vld [vmem:[#allocation8 + $0x55c] sm:$0xf0]  ;;  %v2536_v9 = vor.u32 %v3246_v63, %v2533_v0  ;;  %v2512_v22 = vor.u32 %v3240_v15, %v2509_v16  ;;  %v3396_v63 = vld [vmem:[#allocation8 + $0x5dc] sm:$0xf]  ;;  %v3133_v0 = vld [vmem:[#allocation8 + $0x5f0] sm:$0xf0] }
 0x129   :  { %1892 = vmatpush.bf16.msra.mxu0 %v2460_v10  ;;  %v2819_v10 = vld [vmem:[#allocation8 + $0x368] sm:$0xf]  ;;  %v3060_v14 = vor.u32 %v3381_v4, %v3059_v3  ;;  %v3357_v60 = vld [vmem:[#allocation8 + $0x49c] sm:$0xf0]  ;;  %v3216_v3 = vld [vmem:[#allocation8 + $0x3c] sm:$0xf] }
 0x12a   :  { %v613_v31 = vmax.f32 %v607_v20, 0.0  ;;  %v2820_v19 = vor.u32 %v3321_v11, %v2819_v10  ;;  %v3294_v20 = vld [vmem:[#allocation8 + $0x2ac] sm:$0xf]  ;;  %v2964_v4 = vor.u32 %v3357_v60, %v2963_v59  ;;  %v3336_v6 = vld [vmem:[#allocation8 + $0x3fc] sm:$0xf]  ;;  %v3136_v10 = vor.u32 %v3396_v63, %v3133_v0 }
 0x12b   :  { %1904 = vmatpush.bf16.msra.mxu1 %v2676_v18  ;;  %v3375_v18 = vld [vmem:[#allocation8 + $0x52c] sm:$0xf0]  ;;  %v2893_v8 = vld [vmem:[#allocation8 + $0x410] sm:$0xf0]  ;;  %v3270_v11 = vld [vmem:[#allocation8 + $0x1ec] sm:$0xf] }
 0x12c   :  { %v3636_v35 = vpack.c.bf16 %v613_v31, %v613_v31  ;;  %1915 = vmatpush.bf16.msra.mxu2 %v2916_v21  ;;  %v2725_v21 = vld [vmem:[#allocation8 + $0x2c0] sm:$0xf0]  ;;  %v2755_v46 = vld [vmem:[#allocation8 + $0x2e0] sm:$0xf]  ;;  %v3304_v47 = vld [vmem:[#allocation8 + $0x2f4] sm:$0xf0] }
 0x12d   :  { %1893 = vmatpush.bf16.msra.mxu0 %v2436_v27  ;;  %v595_v40 = vpop.f32.mrf.mxu2  ;;  %v608_v41 = vpop.f32.mrf.mxu3  ;;  %v3036_v27 = vor.u32 %v3375_v18, %v3035_v17  ;;  %v2728_v31 = vor.u32 %v3294_v20, %v2725_v21  ;;  %v3109_v15 = vld [vmem:[#allocation8 + $0x5c0] sm:$0xf0]  ;;  %v3210_v17 = vld [vmem:[#allocation8 + $0xc] sm:$0xf]  ;;  %v2731_v59 = vld [vmem:[#allocation8 + $0x2b0] sm:$0xf] }
 0x12e   :  { %1831 = vmatmul.bf16.vlgmr.msra.gmra.mxu3 %v3636_v35  ;;  %1857 = vmatmul.bf16.vlgmr.msrb.gmra.mxu1 %v3628_v45  ;;  %v3012_v40 = vor.u32 %v3369_v33, %v3011_v32  ;;  %v2461_v41 = vld [vmem:[#allocation8 + $0xb0] sm:$0xf0]  ;;  %v2389_v18 = vld [vmem:[#allocation8 + $0x20] sm:$0xf0]  ;;  %v3298_v60 = vld [vmem:[#allocation8 + $0x2c4] sm:$0xf0] }
 0x12f   :  { %1905 = vmatpush.bf16.msra.mxu1 %v2652_v34  ;;  %1927 = vmatpush.bf16.msra.mxu3 %v3132_v23  ;;  %v2796_v34 = vor.u32 %v3315_v26, %v2795_v25  ;;  %v3288_v23 = vld [vmem:[#allocation8 + $0x27c] sm:$0xf]  ;;  %v2464_v51 = vor.u32 %v3228_v39, %v2461_v41  ;;  %v2869_v20 = vld [vmem:[#allocation8 + $0x3e0] sm:$0xf0]  ;;  %v2563_v25 = vld [vmem:[#allocation8 + $0x160] sm:$0xf]  ;;  %v2392_v32 = vor.u32 %v3210_v17, %v2389_v18 }
 0x130   :  { %1916 = vmatpush.bf16.msra.mxu2 %v2892_v36  ;;  %v2488_v36 = vor.u32 %v3234_v28, %v2485_v29  ;;  %v2704_v44 = vor.u32 %v3288_v23, %v2701_v24  ;;  %v3256_v26 = vld [vmem:[#allocation8 + $0x174] sm:$0xf0]  ;;  %v2605_v28 = vld [vmem:[#allocation8 + $0x1d0] sm:$0xf0]  ;;  %v3384_v29 = vld [vmem:[#allocation8 + $0x57c] sm:$0xf] }
 0x131   :  { %1894 = vmatpush.bf16.msra.mxu0 %v2412_v42  ;;  %v3348_v42 = vld [vmem:[#allocation8 + $0x45c] sm:$0xf]  ;;  %v2845_v24 = vld [vmem:[#allocation8 + $0x3b0] sm:$0xf0]  ;;  %v3250_v39 = vld [vmem:[#allocation8 + $0x144] sm:$0xf0] }
 0x132   :  { %v2944_v52 = vor.u32 %v3348_v42, %v2941_v43  ;;  %v3324_v23 = vld [vmem:[#allocation8 + $0x39c] sm:$0xf]  ;;  %v2581_v41 = vld [vmem:[#allocation8 + $0x1a0] sm:$0xf0]  ;;  %v3378_v42 = vld [vmem:[#allocation8 + $0x54c] sm:$0xf] }
 0x133   :  { %1906 = vmatpush.bf16.msra.mxu1 %v2628_v48  ;;  %1928 = vmatpush.bf16.msra.mxu3 %v3108_v49  ;;  %v2772_v48 = vor.u32 %v3309_v38, %v2771_v37  ;;  %v3282_v49 = vld [vmem:[#allocation8 + $0x24c] sm:$0xf]  ;;  %v2539_v38 = vld [vmem:[#allocation8 + $0x130] sm:$0xf]  ;;  %v3061_v43 = vld [vmem:[#allocation8 + $0x560] sm:$0xf0] }
 0x134   :  { %1917 = vmatpush.bf16.msra.mxu2 %v2868_v53  ;;  %v3222_v53 = vld [vmem:[#allocation8 + $0x6c] sm:$0xf]  ;;  %v2797_v63 = vld [vmem:[#allocation8 + $0x350] sm:$0xf0]  ;;  %v3352_v17 = vld [vmem:[#allocation8 + $0x474] sm:$0xf0] }
 0x135   :  { %1895 = vmatpush.bf16.msra.mxu0 %v2388_v57  ;;  %v2917_v57 = vld [vmem:[#allocation8 + $0x440] sm:$0xf0]  ;;  %v2440_v1 = vor.u32 %v3222_v53, %v2437_v55  ;;  %v2515_v53 = vld [vmem:[#allocation8 + $0x100] sm:$0xf]  ;;  %v2756_v55 = vor.u32 %v3304_v47, %v2755_v46 }
 0x136   :  { %v2920_v2 = vor.u32 %v3342_v56, %v2917_v57  ;;  %v3372_v56 = vld [vmem:[#allocation8 + $0x51c] sm:$0xf]  ;;  %v3037_v57 = vld [vmem:[#allocation8 + $0x530] sm:$0xf0] }
 0x137   :  { %1907 = vmatpush.bf16.msra.mxu1 %v2604_v61  ;;  %1929 = vmatpush.bf16.msra.mxu3 %v3084_v62  ;;  %v3276_v61 = vld [vmem:[#allocation8 + $0x21c] sm:$0xf]  ;;  %v2653_v62 = vld [vmem:[#allocation8 + $0x230] sm:$0xf0]  ;;  %v3040_v0 = vor.u32 %v3372_v56, %v3037_v57  ;;  %v3214_v57 = vld [vmem:[#allocation8 + $0x24] sm:$0xf0] }
 0x138   :  { %1870 = vmatmul.bf16.vlgmr.msrb.gmra.mxu2 %v3632_v7  ;;  %1896 = vmatmul.bf16.vlgmr.msra.gmra.mxu0 %v3624_v30 }
 0x139   :  { %1940 = vmatpush.bf16.msrb.mxu0 %v2560_v58  ;;  %1918 = vmatpush.bf16.msra.mxu2 %v2844_v5  ;;  %v2680_v58 = vor.u32 %v3282_v49, %v2677_v50  ;;  %v2413_v5 = vld [vmem:[#allocation8 + $0x50] sm:$0xf0]  ;;  %v3318_v49 = vld [vmem:[#allocation8 + $0x36c] sm:$0xf]  ;;  %v2821_v50 = vld [vmem:[#allocation8 + $0x380] sm:$0xf0] }
 0x13a   :  { %v2416_v16 = vor.u32 %v3216_v3, %v2413_v5  ;;  %v2732_v3 = vor.u32 %v3298_v60, %v2731_v59  ;;  %v3013_v5 = vld [vmem:[#allocation8 + $0x500] sm:$0xf0]  ;;  %v3334_v59 = vld [vmem:[#allocation8 + $0x3e4] sm:$0xf0] }
 0x13b   :  { %1908 = vmatpush.bf16.msra.mxu1 %v2580_v12  ;;  %1930 = vmatpush.bf16.msra.mxu3 %v3060_v14  ;;  %v2629_v12 = vld [vmem:[#allocation8 + $0x200] sm:$0xf0]  ;;  %v3390_v14 = vld [vmem:[#allocation8 + $0x5ac] sm:$0xf] }
 0x13c   :  { %v2632_v21 = vor.u32 %v3270_v11, %v2629_v12  ;;  %v3306_v11 = vld [vmem:[#allocation8 + $0x30c] sm:$0xf]  ;;  %v2773_v12 = vld [vmem:[#allocation8 + $0x320] sm:$0xf0] }
 0x13d   :  { %1941 = vmatpush.bf16.msrb.mxu0 %v2536_v9  ;;  %1919 = vmatpush.bf16.msra.mxu2 %v2820_v19  ;;  %v2656_v9 = vor.u32 %v3276_v61, %v2653_v62  ;;  %v3330_v19 = vld [vmem:[#allocation8 + $0x3cc] sm:$0xf]  ;;  %v3312_v62 = vld [vmem:[#allocation8 + $0x33c] sm:$0xf] }
 0x13e   :  { %1883 = vmatmul.bf16.vlgmr.msrb.gmra.mxu3 %v3636_v35  ;;  %1909 = vmatmul.bf16.vlgmr.msra.gmra.mxu1 %v3628_v45  ;;  %v2872_v33 = vor.u32 %v3330_v19, %v2869_v20  ;;  %v3360_v19 = vld [vmem:[#allocation8 + $0x4bc] sm:$0xf]  ;;  %v2989_v20 = vld [vmem:[#allocation8 + $0x4d0] sm:$0xf0] }
 0x13f   :  { %1953 = vmatpush.bf16.msrb.mxu1 %v2752_v13  ;;  %1931 = vmatpush.bf16.msra.mxu3 %v3036_v27  ;;  %v2896_v13 = vor.u32 %v3336_v6, %v2893_v8  ;;  %v3264_v27 = vld [vmem:[#allocation8 + $0x1bc] sm:$0xf]  ;;  %v2800_v6 = vor.u32 %v3312_v62, %v2797_v63  ;;  %v2707_v8 = vld [vmem:[#allocation8 + $0x280] sm:$0xf]  ;;  %v3253_v62 = vld [vmem:[#allocation8 + $0x164] sm:$0xf] }
 0x140   :  { %v2565_v63 = vld [vmem:[#allocation8 + $0x178] sm:$0xf0] }
 0x141   :  { %1942 = vmatpush.bf16.msrb.mxu0 %v2512_v22  ;;  %1920 = vmatpush.bf16.msra.mxu2 %v2796_v34  ;;  %v3112_v22 = vor.u32 %v3390_v14, %v3109_v15  ;;  %v2564_v34 = vor.u32 %v3256_v26, %v2563_v25  ;;  %v2467_v14 = vld [vmem:[#allocation8 + $0xa0] sm:$0xf]  ;;  %v3286_v25 = vld [vmem:[#allocation8 + $0x264] sm:$0xf0] }
 0x143   :  { %1954 = vmatpush.bf16.msrb.mxu1 %v2728_v31  ;;  %1932 = vmatpush.bf16.msra.mxu3 %v3012_v40  ;;  %v3085_v31 = vld [vmem:[#allocation8 + $0x590] sm:$0xf0]  ;;  %v3258_v40 = vld [vmem:[#allocation8 + $0x18c] sm:$0xf] }
 0x144   :  { %v3088_v37 = vor.u32 %v3384_v29, %v3085_v31  ;;  %v2992_v29 = vor.u32 %v3360_v19, %v2989_v20  ;;  %v3226_v31 = vld [vmem:[#allocation8 + $0x84] sm:$0xf0]  ;;  %v2757_v19 = vld [vmem:[#allocation8 + $0x2f8] sm:$0xf0] }
 0x145   :  { %1943 = vmatpush.bf16.msrb.mxu0 %v2488_v36  ;;  %1921 = vmatpush.bf16.msra.mxu2 %v2772_v48  ;;  %v2608_v36 = vor.u32 %v3264_v27, %v2605_v28  ;;  %v2540_v48 = vor.u32 %v3250_v39, %v2539_v38  ;;  %v2443_v28 = vld [vmem:[#allocation8 + $0x70] sm:$0xf]  ;;  %v3139_v38 = vld [vmem:[#allocation8 + $0x5e0] sm:$0xf]  ;;  %v3400_v39 = vld [vmem:[#allocation8 + $0x5f4] sm:$0xf0] }
 0x146   :  { %v3140_v47 = vor.u32 %v3400_v39, %v3139_v38  ;;  %v2803_v38 = vld [vmem:[#allocation8 + $0x340] sm:$0xf]  ;;  %v3316_v39 = vld [vmem:[#allocation8 + $0x354] sm:$0xf0] }
 0x147   :  { %1955 = vmatpush.bf16.msrb.mxu1 %v2704_v44  ;;  %1933 = vmatpush.bf16.msra.mxu3 %v2988_v54  ;;  %v2848_v44 = vor.u32 %v3324_v23, %v2845_v24  ;;  %v3244_v54 = vld [vmem:[#allocation8 + $0x114] sm:$0xf0]  ;;  %v3354_v23 = vld [vmem:[#allocation8 + $0x48c] sm:$0xf]  ;;  %v2965_v24 = vld [vmem:[#allocation8 + $0x4a0] sm:$0xf0] }
 0x148   :  { %1922 = vmatmul.bf16.vlgmr.msra.gmra.mxu2 %v3632_v7  ;;  %v2516_v61 = vor.u32 %v3244_v54, %v2515_v53  ;;  %v3394_v53 = vld [vmem:[#allocation8 + $0x5c4] sm:$0xf0] }
 0x149   :  { %1944 = vmatpush.bf16.msrb.mxu0 %v2464_v51  ;;  %1966 = vmatpush.bf16.msrb.mxu2 %v2944_v52  ;;  %v2584_v51 = vor.u32 %v3258_v40, %v2581_v41  ;;  %v3064_v52 = vor.u32 %v3378_v42, %v3061_v43  ;;  %v2444_v40 = vor.u32 %v3226_v31, %v2443_v28  ;;  %v2419_v43 = vld [vmem:[#allocation8 + $0x40] sm:$0xf]  ;;  %v3241_v28 = vld [vmem:[#allocation8 + $0x104] sm:$0xf]  ;;  %v2517_v31 = vld [vmem:[#allocation8 + $0x118] sm:$0xf0] }
 0x14a   :  { %v2968_v42 = vor.u32 %v3354_v23, %v2965_v24  ;;  %v2733_v23 = vld [vmem:[#allocation8 + $0x2c8] sm:$0xf0] }
 0x14b   :  { %1956 = vmatpush.bf16.msrb.mxu1 %v2680_v58  ;;  %1934 = vmatpush.bf16.msra.mxu3 %v2964_v4  ;;  %v2824_v58 = vor.u32 %v3318_v49, %v2821_v50  ;;  %v3366_v4 = vld [vmem:[#allocation8 + $0x4ec] sm:$0xf]  ;;  %v3340_v49 = vld [vmem:[#allocation8 + $0x414] sm:$0xf0]  ;;  %v2635_v50 = vld [vmem:[#allocation8 + $0x1f0] sm:$0xf] }
 0x14c   :  { %v3016_v15 = vor.u32 %v3366_v4, %v3013_v5 }
 0x14d   :  { %1945 = vmatpush.bf16.msrb.mxu0 %v2440_v1  ;;  %1967 = vmatpush.bf16.msrb.mxu2 %v2920_v2  ;;  %v2491_v1 = vld [vmem:[#allocation8 + $0xd0] sm:$0xf]  ;;  %v3238_v2 = vld [vmem:[#allocation8 + $0xe4] sm:$0xf0] }
 0x14e   :  { %1935 = vmatmul.bf16.vlgmr.msra.gmra.mxu3 %v3636_v35 }
 0x14f   :  { %1957 = vmatpush.bf16.msrb.mxu1 %v2656_v9  ;;  %1979 = vmatpush.bf16.msrb.mxu3 %v3136_v10  ;;  %v3292_v9 = vld [vmem:[#allocation8 + $0x294] sm:$0xf0]  ;;  %v2492_v10 = vor.u32 %v3238_v2, %v2491_v1  ;;  %v3091_v2 = vld [vmem:[#allocation8 + $0x580] sm:$0xf] }
 0x150   :  { %v2708_v18 = vor.u32 %v3292_v9, %v2707_v8  ;;  %v3268_v1 = vld [vmem:[#allocation8 + $0x1d4] sm:$0xf0]  ;;  %v2851_v8 = vld [vmem:[#allocation8 + $0x3a0] sm:$0xf] }
 0x151   :  { %1946 = vmatpush.bf16.msrb.mxu0 %v2416_v16  ;;  %1968 = vmatpush.bf16.msrb.mxu2 %v2896_v13  ;;  %v3232_v16 = vld [vmem:[#allocation8 + $0xb4] sm:$0xf0]  ;;  %v2947_v13 = vld [vmem:[#allocation8 + $0x460] sm:$0xf] }
 0x152   :  { %v2468_v26 = vor.u32 %v3232_v16, %v2467_v14  ;;  %v2948_v27 = vor.u32 %v3352_v17, %v2947_v13  ;;  %v3328_v9 = vld [vmem:[#allocation8 + $0x3b4] sm:$0xf0]  ;;  %v2541_v14 = vld [vmem:[#allocation8 + $0x148] sm:$0xf0]  ;;  %v3262_v16 = vld [vmem:[#allocation8 + $0x1a4] sm:$0xf0] }
 0x153   :  { %1958 = vmatpush.bf16.msrb.mxu1 %v2632_v21  ;;  %1980 = vmatpush.bf16.msrb.mxu3 %v3112_v22  ;;  %v2776_v21 = vor.u32 %v3306_v11, %v2773_v12  ;;  %v2683_v22 = vld [vmem:[#allocation8 + $0x250] sm:$0xf]  ;;  %v3247_v12 = vld [vmem:[#allocation8 + $0x134] sm:$0xf]  ;;  %v3382_v17 = vld [vmem:[#allocation8 + $0x564] sm:$0xf0]  ;;  %v2852_v20 = vor.u32 %v3328_v9, %v2851_v8 }
 0x154   :  { %v3067_v13 = vld [vmem:[#allocation8 + $0x550] sm:$0xf]  ;;  %v3358_v9 = vld [vmem:[#allocation8 + $0x4a4] sm:$0xf0] }
 0x155   :  { %1947 = vmatpush.bf16.msrb.mxu0 %v2392_v32  ;;  %1969 = vmatpush.bf16.msrb.mxu2 %v2872_v33  ;;  %v2923_v32 = vld [vmem:[#allocation8 + $0x430] sm:$0xf]  ;;  %v3346_v33 = vld [vmem:[#allocation8 + $0x444] sm:$0xf0] }
 0x156   :  { %v2924_v41 = vor.u32 %v3346_v33, %v2923_v32  ;;  %v3043_v32 = vld [vmem:[#allocation8 + $0x520] sm:$0xf]  ;;  %v3376_v33 = vld [vmem:[#allocation8 + $0x534] sm:$0xf0]  ;;  %v2971_v8 = vld [vmem:[#allocation8 + $0x490] sm:$0xf] }
 0x157   :  { %1959 = vmatpush.bf16.msrb.mxu1 %v2608_v36  ;;  %1981 = vmatpush.bf16.msrb.mxu3 %v3088_v37  ;;  %v2659_v36 = vld [vmem:[#allocation8 + $0x220] sm:$0xf]  ;;  %v3280_v37 = vld [vmem:[#allocation8 + $0x234] sm:$0xf0] }
 0x158   :  { %1948 = vmatmul.bf16.vlgmr.msrb.gmra.mxu0 %v3624_v30  ;;  %v2660_v46 = vor.u32 %v3280_v37, %v2659_v36  ;;  %v2520_v36 = vor.u32 %v3241_v28, %v2517_v31  ;;  %v3044_v37 = vor.u32 %v3376_v33, %v3043_v32  ;;  %v3117_v28 = vld [vmem:[#allocation8 + $0x5c8] sm:$0xf0]  ;;  %v3211_v33 = vld [vmem:[#allocation8 + $0x14] sm:$0xf] }
 0x159   :  { %1992 = vmatpush.bf16.msra.mxu0 %v2564_v34  ;;  %1970 = vmatpush.bf16.msrb.mxu2 %v2848_v44  ;;  %v2684_v34 = vor.u32 %v3286_v25, %v2683_v22  ;;  %v3220_v44 = vld [vmem:[#allocation8 + $0x54] sm:$0xf0]  ;;  %v3068_v25 = vor.u32 %v3382_v17, %v3067_v13  ;;  %v2972_v13 = vor.u32 %v3358_v9, %v2971_v8 }
 0x15a   :  { %v2420_v54 = vor.u32 %v3220_v44, %v2419_v43  ;;  %v3019_v43 = vld [vmem:[#allocation8 + $0x4f0] sm:$0xf]  ;;  %v3370_v44 = vld [vmem:[#allocation8 + $0x504] sm:$0xf0] }
 0x15b   :  { %1960 = vmatpush.bf16.msrb.mxu1 %v2584_v51  ;;  %1982 = vmatpush.bf16.msrb.mxu3 %v3064_v52  ;;  %v3274_v51 = vld [vmem:[#allocation8 + $0x204] sm:$0xf0]  ;;  %v3115_v52 = vld [vmem:[#allocation8 + $0x5b0] sm:$0xf] }
 0x15c   :  { %v2636_v60 = vor.u32 %v3274_v51, %v2635_v50  ;;  %v3020_v51 = vor.u32 %v3370_v44, %v3019_v43  ;;  %v3325_v44 = vld [vmem:[#allocation8 + $0x3a4] sm:$0xf] }
 0x15d   :  { %1993 = vmatpush.bf16.msra.mxu0 %v2540_v48  ;;  %1971 = vmatpush.bf16.msrb.mxu2 %v2824_v58  ;;  %v2899_v48 = vld [vmem:[#allocation8 + $0x400] sm:$0xf]  ;;  %v2875_v58 = vld [vmem:[#allocation8 + $0x3d0] sm:$0xf] }
 0x15e   :  { %1961 = vmatmul.bf16.vlgmr.msrb.gmra.mxu1 %v3628_v45  ;;  %v2900_v56 = vor.u32 %v3340_v49, %v2899_v48  ;;  %v2876_v5 = vor.u32 %v3334_v59, %v2875_v58  ;;  %v2804_v48 = vor.u32 %v3316_v39, %v2803_v38  ;;  %v2779_v49 = vld [vmem:[#allocation8 + $0x310] sm:$0xf]  ;;  %v2995_v58 = vld [vmem:[#allocation8 + $0x4c0] sm:$0xf]  ;;  %v3364_v59 = vld [vmem:[#allocation8 + $0x4d4] sm:$0xf0] }
 0x15f   :  { %2005 = vmatpush.bf16.msra.mxu1 %v2756_v55  ;;  %1983 = vmatpush.bf16.msrb.mxu3 %v3040_v0  ;;  %v2395_v55 = vld [vmem:[#allocation8 + $0x10] sm:$0xf]  ;;  %v2611_v0 = vld [vmem:[#allocation8 + $0x1c0] sm:$0xf]  ;;  %v2613_v38 = vld [vmem:[#allocation8 + $0x1d8] sm:$0xf0] }
 0x160   :  { %v2396_v4 = vor.u32 %v3214_v57, %v2395_v55  ;;  %v2949_v57 = vld [vmem:[#allocation8 + $0x478] sm:$0xf0]  ;;  %v3385_v39 = vld [vmem:[#allocation8 + $0x584] sm:$0xf] }
 0x161   :  { %1994 = vmatpush.bf16.msra.mxu0 %v2516_v61  ;;  %1972 = vmatpush.bf16.msrb.mxu2 %v2800_v6  ;;  %v3116_v61 = vor.u32 %v3394_v53, %v3115_v52  ;;  %v2568_v6 = vor.u32 %v3253_v62, %v2565_v63  ;;  %v3310_v52 = vld [vmem:[#allocation8 + $0x324] sm:$0xf0]  ;;  %v3229_v53 = vld [vmem:[#allocation8 + $0xa4] sm:$0xf] }
 0x162   :  { %v2780_v62 = vor.u32 %v3310_v52, %v2779_v49  ;;  %v2589_v49 = vld [vmem:[#allocation8 + $0x1a8] sm:$0xf0] }
 0x163   :  { %2006 = vmatpush.bf16.msra.mxu1 %v2732_v3  ;;  %1984 = vmatpush.bf16.msrb.mxu3 %v3016_v15  ;;  %v3388_v3 = vld [vmem:[#allocation8 + $0x594] sm:$0xf0]  ;;  %v2587_v15 = vld [vmem:[#allocation8 + $0x190] sm:$0xf] }
 0x164   :  { %v3092_v11 = vor.u32 %v3388_v3, %v3091_v2  ;;  %v2588_v22 = vor.u32 %v3262_v16, %v2587_v15  ;;  %v2445_v2 = vld [vmem:[#allocation8 + $0x88] sm:$0xf0]  ;;  %v2996_v3 = vor.u32 %v3364_v59, %v2995_v58  ;;  %v3045_v58 = vld [vmem:[#allocation8 + $0x538] sm:$0xf0] }
 0x165   :  { %1995 = vmatpush.bf16.msra.mxu0 %v2492_v10  ;;  %1973 = vmatpush.bf16.msrb.mxu2 %v2776_v21  ;;  %v2612_v10 = vor.u32 %v3268_v1, %v2611_v0  ;;  %v2544_v21 = vor.u32 %v3247_v12, %v2541_v14  ;;  %v3223_v1 = vld [vmem:[#allocation8 + $0x74] sm:$0xf]  ;;  %v3397_v12 = vld [vmem:[#allocation8 + $0x5e4] sm:$0xf]  ;;  %v3141_v14 = vld [vmem:[#allocation8 + $0x5f8] sm:$0xf0] }
 0x166   :  { %v2448_v15 = vor.u32 %v3223_v1, %v2445_v2  ;;  %v3021_v1 = vld [vmem:[#allocation8 + $0x508] sm:$0xf0] }
 0x167   :  { %2007 = vmatpush.bf16.msra.mxu1 %v2708_v18  ;;  %1985 = vmatpush.bf16.msrb.mxu3 %v2992_v29  ;;  %v3301_v18 = vld [vmem:[#allocation8 + $0x2e4] sm:$0xf] }
 0x168   :  { %1974 = vmatmul.bf16.vlgmr.msrb.gmra.mxu2 %v3632_v7  ;;  %v2760_v29 = vor.u32 %v3301_v18, %v2757_v19  ;;  %v3217_v18 = vld [vmem:[#allocation8 + $0x44] sm:$0xf]  ;;  %v2421_v19 = vld [vmem:[#allocation8 + $0x58] sm:$0xf0] }
 0x169   :  { %1996 = vmatpush.bf16.msra.mxu0 %v2468_v26  ;;  %2018 = vmatpush.bf16.msra.mxu2 %v2948_v27  ;;  %v2827_v26 = vld [vmem:[#allocation8 + $0x370] sm:$0xf]  ;;  %v3322_v27 = vld [vmem:[#allocation8 + $0x384] sm:$0xf0] }
 0x16a   :  { %v2828_v24 = vor.u32 %v3322_v27, %v2827_v26  ;;  %v2637_v26 = vld [vmem:[#allocation8 + $0x208] sm:$0xf0]  ;;  %v3391_v27 = vld [vmem:[#allocation8 + $0x5b4] sm:$0xf] }
 0x16b   :  { %2008 = vmatpush.bf16.msra.mxu1 %v2684_v34  ;;  %1986 = vmatpush.bf16.msrb.mxu3 %v2968_v42  ;;  %v3295_v34 = vld [vmem:[#allocation8 + $0x2b4] sm:$0xf]  ;;  %v2493_v42 = vld [vmem:[#allocation8 + $0xe8] sm:$0xf0] }
 0x16d   :  { %1997 = vmatpush.bf16.msra.mxu0 %v2444_v40  ;;  %2019 = vmatpush.bf16.msra.mxu2 %v2924_v41  ;;  %v3235_v40 = vld [vmem:[#allocation8 + $0xd4] sm:$0xf]  ;;  %v2736_v41 = vor.u32 %v3295_v34, %v2733_v23  ;;  %v2397_v34 = vld [vmem:[#allocation8 + $0x28] sm:$0xf0] }
 0x16e   :  { %1987 = vmatmul.bf16.vlgmr.msrb.gmra.mxu3 %v3636_v35  ;;  %v2496_v50 = vor.u32 %v3235_v40, %v2493_v42  ;;  %v3331_v23 = vld [vmem:[#allocation8 + $0x3d4] sm:$0xf]  ;;  %v3093_v40 = vld [vmem:[#allocation8 + $0x598] sm:$0xf0] }
 0x16f   :  { %2009 = vmatpush.bf16.msra.mxu1 %v2660_v46  ;;  %2031 = vmatpush.bf16.msra.mxu3 %v3140_v47  ;;  %v3289_v46 = vld [vmem:[#allocation8 + $0x284] sm:$0xf]  ;;  %v2709_v47 = vld [vmem:[#allocation8 + $0x298] sm:$0xf0] }
 0x170   :  { %v2712_v55 = vor.u32 %v3289_v46, %v2709_v47  ;;  %v3096_v46 = vor.u32 %v3385_v39, %v3093_v40  ;;  %v2853_v47 = vld [vmem:[#allocation8 + $0x3b8] sm:$0xf0] }
 0x171   :  { %1998 = vmatpush.bf16.msra.mxu0 %v2420_v54  ;;  %2020 = vmatpush.bf16.msra.mxu2 %v2900_v56  ;;  %v2469_v54 = vld [vmem:[#allocation8 + $0xb8] sm:$0xf0]  ;;  %v3349_v56 = vld [vmem:[#allocation8 + $0x464] sm:$0xf]  ;;  %v2856_v52 = vor.u32 %v3325_v44, %v2853_v47 }
 0x172   :  { %v2472_v63 = vor.u32 %v3229_v53, %v2469_v54  ;;  %v2952_v0 = vor.u32 %v3349_v56, %v2949_v57  ;;  %v2829_v56 = vld [vmem:[#allocation8 + $0x388] sm:$0xf0]  ;;  %v3373_v57 = vld [vmem:[#allocation8 + $0x524] sm:$0xf] }
 0x173   :  { %2010 = vmatpush.bf16.msra.mxu1 %v2636_v60  ;;  %2032 = vmatpush.bf16.msra.mxu3 %v3116_v61  ;;  %v3283_v60 = vld [vmem:[#allocation8 + $0x254] sm:$0xf]  ;;  %v2685_v61 = vld [vmem:[#allocation8 + $0x268] sm:$0xf0] }
 0x175   :  { %1999 = vmatpush.bf16.msra.mxu0 %v2396_v4  ;;  %2021 = vmatpush.bf16.msra.mxu2 %v2876_v5  ;;  %v2688_v4 = vor.u32 %v3283_v60, %v2685_v61  ;;  %v3343_v5 = vld [vmem:[#allocation8 + $0x434] sm:$0xf]  ;;  %v3048_v60 = vor.u32 %v3373_v57, %v3045_v58  ;;  %v3313_v61 = vld [vmem:[#allocation8 + $0x344] sm:$0xf] }
 0x177   :  { %2011 = vmatpush.bf16.msra.mxu1 %v2612_v10  ;;  %2033 = vmatpush.bf16.msra.mxu3 %v3092_v11  ;;  %v3277_v10 = vld [vmem:[#allocation8 + $0x224] sm:$0xf]  ;;  %v2661_v11 = vld [vmem:[#allocation8 + $0x238] sm:$0xf0] }
 0x178   :  { %2000 = vmatmul.bf16.vlgmr.msra.gmra.mxu0 %v3624_v30  ;;  %v2664_v17 = vor.u32 %v3277_v10, %v2661_v11 }
 0x179   :  { %2044 = vmatpush.bf16.msrb.mxu0 %v2568_v6  ;;  %2022 = vmatpush.bf16.msra.mxu2 %v2852_v20  ;;  %v2925_v6 = vld [vmem:[#allocation8 + $0x448] sm:$0xf0]  ;;  %v3337_v20 = vld [vmem:[#allocation8 + $0x404] sm:$0xf] }
 0x17a   :  { %v2928_v16 = vor.u32 %v3343_v5, %v2925_v6  ;;  %v3361_v5 = vld [vmem:[#allocation8 + $0x4c4] sm:$0xf]  ;;  %v2997_v6 = vld [vmem:[#allocation8 + $0x4d8] sm:$0xf0] }
 0x17b   :  { %2012 = vmatpush.bf16.msra.mxu1 %v2588_v22  ;;  %2034 = vmatpush.bf16.msra.mxu3 %v3068_v25  ;;  %v2901_v22 = vld [vmem:[#allocation8 + $0x418] sm:$0xf0]  ;;  %v3271_v25 = vld [vmem:[#allocation8 + $0x1f4] sm:$0xf]  ;;  %v3000_v10 = vor.u32 %v3361_v5, %v2997_v6 }
 0x17c   :  { %v2904_v31 = vor.u32 %v3337_v20, %v2901_v22  ;;  %v2640_v32 = vor.u32 %v3271_v25, %v2637_v26 }
 0x17d   :  { %2045 = vmatpush.bf16.msrb.mxu0 %v2544_v21  ;;  %2023 = vmatpush.bf16.msra.mxu2 %v2828_v24  ;;  %v3144_v21 = vor.u32 %v3397_v12, %v3141_v14  ;;  %v3120_v24 = vor.u32 %v3391_v27, %v3117_v28  ;;  %v3355_v12 = vld [vmem:[#allocation8 + $0x494] sm:$0xf]  ;;  %v2973_v14 = vld [vmem:[#allocation8 + $0x4a8] sm:$0xf0] }
 0x17e   :  { %2013 = vmatmul.bf16.vlgmr.msra.gmra.mxu1 %v3628_v45 }
 0x17f   :  { %2057 = vmatpush.bf16.msrb.mxu1 %v2760_v29  ;;  %2035 = vmatpush.bf16.msra.mxu3 %v3044_v37  ;;  %v2424_v29 = vor.u32 %v3217_v18, %v2421_v19  ;;  %v3265_v37 = vld [vmem:[#allocation8 + $0x1c4] sm:$0xf] }
 0x180   :  { %v2616_v43 = vor.u32 %v3265_v37, %v2613_v38 }
 0x181   :  { %2046 = vmatpush.bf16.msrb.mxu0 %v2520_v36  ;;  %2024 = vmatpush.bf16.msra.mxu2 %v2804_v48  ;;  %v2877_v36 = vld [vmem:[#allocation8 + $0x3e8] sm:$0xf0]  ;;  %v3259_v48 = vld [vmem:[#allocation8 + $0x194] sm:$0xf] }
 0x182   :  { %v2880_v42 = vor.u32 %v3331_v23, %v2877_v36  ;;  %v2592_v53 = vor.u32 %v3259_v48, %v2589_v49 }
 0x183   :  { %2058 = vmatpush.bf16.msrb.mxu1 %v2736_v41  ;;  %2036 = vmatpush.bf16.msra.mxu3 %v3020_v51  ;;  %v2400_v41 = vor.u32 %v3211_v33, %v2397_v34  ;;  %v3069_v51 = vld [vmem:[#allocation8 + $0x568] sm:$0xf0] }
 0x185   :  { %2047 = vmatpush.bf16.msrb.mxu0 %v2496_v50  ;;  %2025 = vmatpush.bf16.msra.mxu2 %v2780_v62  ;;  %v3379_v50 = vld [vmem:[#allocation8 + $0x554] sm:$0xf]  ;;  %v2805_v62 = vld [vmem:[#allocation8 + $0x358] sm:$0xf0] }
 0x186   :  { %v3072_v54 = vor.u32 %v3379_v50, %v3069_v51  ;;  %v2808_v2 = vor.u32 %v3313_v61, %v2805_v62 }
 0x187   :  { %2059 = vmatpush.bf16.msrb.mxu1 %v2712_v55  ;;  %2037 = vmatpush.bf16.msra.mxu3 %v2996_v3  ;;  %v3319_v55 = vld [vmem:[#allocation8 + $0x374] sm:$0xf] }
 0x188   :  { %2026 = vmatmul.bf16.vlgmr.msra.gmra.mxu2 %v3632_v7  ;;  %v2832_v59 = vor.u32 %v3319_v55, %v2829_v56 }
 0x189   :  { %2048 = vmatpush.bf16.msrb.mxu0 %v2472_v63  ;;  %2070 = vmatpush.bf16.msrb.mxu2 %v2952_v0  ;;  %v3367_v0 = vld [vmem:[#allocation8 + $0x4f4] sm:$0xf] }
 0x18a   :  { %v3024_v3 = vor.u32 %v3367_v0, %v3021_v1 }
 0x18b   :  { %2060 = vmatpush.bf16.msrb.mxu1 %v2688_v4  ;;  %2038 = vmatpush.bf16.msra.mxu3 %v2972_v13  ;;  %v3307_v4 = vld [vmem:[#allocation8 + $0x314] sm:$0xf] }
 0x18d   :  { %2049 = vmatpush.bf16.msrb.mxu0 %v2448_v15  ;;  %2071 = vmatpush.bf16.msrb.mxu2 %v2928_v16  ;;  %v2976_v15 = vor.u32 %v3355_v12, %v2973_v14  ;;  %v3660_v16 = vld [vmem:[%s3678_s6] sm:$0x3f]  ;;  %s3549_s6 = smov [#allocation10]  }
 0x18e   :  { %2039 = vmatmul.bf16.vlgmr.msra.gmra.mxu3 %v3636_v35  ;;  %v815_v56 = vperm.slane %v3660_v16, 3  ;;  %s2107_s25 = sshll.u32 %s3549_s6, 4  ;;  %s2108_s25 = int_to_ptr.vmem [resolvable:$true] %s2107_s25 }
 0x18f   :  { %2061 = vmatpush.bf16.msrb.mxu1 %v2664_v17  ;;  %2083 = vmatpush.bf16.msrb.mxu3 %v3144_v21  ;;  %v812_v17 = vperm.slane %v3660_v16, 0 }
 0x191   :  { %2050 = vmatpush.bf16.msrb.mxu0 %v2424_v29  ;;  %2072 = vmatpush.bf16.msrb.mxu2 %v2904_v31  ;;  %v813_v31 = vperm.slane %v3660_v16, 1 }
 0x193   :  { %2062 = vmatpush.bf16.msrb.mxu1 %v2640_v32  ;;  %2084 = vmatpush.bf16.msrb.mxu3 %v3120_v24 }
 0x194   :  { %v1793_v63 = vpop.f32.mrf.mxu0 }
 0x195   :  { %2051 = vmatpush.bf16.msrb.mxu0 %v2400_v41  ;;  %2073 = vmatpush.bf16.msrb.mxu2 %v2880_v42  ;;  %v1794_v20 = vadd.f32 %v1793_v63, %v812_v17  ;;  %v814_v41 = vperm.slane %v3660_v16, 2 }
 0x197   :  { %2063 = vmatpush.bf16.msrb.mxu1 %v2616_v43  ;;  %2085 = vmatpush.bf16.msrb.mxu3 %v3096_v46 }
 0x198   :  { %2052 = vmatmul.bf16.vlgmr.msrb.gmra.mxu0 %v3624_v30  ;;  %v2781_v30 = vld [vmem:[#allocation8 + $0x328] sm:$0xf0] }
 0x199   :  { %2074 = vmatpush.bf16.msrb.mxu2 %v2856_v52  ;;  %v2784_v8 = vor.u32 %v3307_v4, %v2781_v30  ;;  %v816_v30 = vperm.slane %v3660_v16, 4 }
 0x19b   :  { %2064 = vmatpush.bf16.msrb.mxu1 %v2592_v53  ;;  %2086 = vmatpush.bf16.msrb.mxu3 %v3072_v54  ;;  %v1806_v9 = vpop.f32.mrf.mxu1 }
 0x19c   :  { %v1795_v11 = vpop.f32.mrf.mxu0  ;;  %v1807_v22 = vadd.f32 %v1806_v9, %v1794_v20 }
 0x19d   :  { %2075 = vmatpush.bf16.msrb.mxu2 %v2832_v59 }
 0x19e   :  { %2065 = vmatmul.bf16.vlgmr.msrb.gmra.mxu1 %v3628_v45 }
 0x19f   :  { %2087 = vmatpush.bf16.msrb.mxu3 %v3048_v60 }
 0x1a1   :  { %2076 = vmatpush.bf16.msrb.mxu2 %v2808_v2 }
 0x1a3   :  { %2088 = vmatpush.bf16.msrb.mxu3 %v3024_v3  ;;  %v1808_v45 = vpop.f32.mrf.mxu1 }
 0x1a5   :  { %2077 = vmatpush.bf16.msrb.mxu2 %v2784_v8  ;;  %v1845_v13 = vpop.f32.mrf.mxu0 }
 0x1a6   :  { %v1846_v34 = vadd.f32 %v1845_v13, %v813_v31 }
 0x1a7   :  { %2089 = vmatpush.bf16.msrb.mxu3 %v3000_v10 }
 0x1a8   :  { %2078 = vmatmul.bf16.vlgmr.msrb.gmra.mxu2 %v3632_v7 }
 0x1aa   :  { %v1819_v18 = vpop.f32.mrf.mxu2 }
 0x1ab   :  { %2090 = vmatpush.bf16.msrb.mxu3 %v2976_v15  ;;  %v1858_v19 = vpop.f32.mrf.mxu1  ;;  %v1820_v25 = vadd.f32 %v1819_v18, %v1807_v22  ;;  %v817_v18 = vperm.slane %v3660_v16, 5 }
 0x1ac   :  { %v1859_v24 = vadd.f32 %v1858_v19, %v1846_v34 }
 0x1ad   :  { %v1847_v21 = vpop.f32.mrf.mxu0 }
 0x1ae   :  { %2091 = vmatmul.bf16.vlgmr.msrb.gmra.mxu3 %v3636_v35 }
 0x1b1   :  { %v1832_v26 = vpop.f32.mrf.mxu3 }
 0x1b2   :  { %v1833_v7 = vadd.f32 %v1832_v26, %v1820_v25  ;;  %v1821_v27 = vpop.f32.mrf.mxu2 }
 0x1b3   :  { %v1860_v28 = vpop.f32.mrf.mxu1 }
 0x1b4   :  { %2096 = vst [vmem:[#allocation10] sm:$0xff] %v1833_v7 }
 0x1b5   :  { %v1897_v29 = vpop.f32.mrf.mxu0 }
 0x1b6   :  { %v1898_v44 = vadd.f32 %v1897_v29, %v814_v41 }
 0x1b9   :  { %v1834_v32 = vpop.f32.mrf.mxu3 }
 0x1bb   :  { %v1871_v33 = vpop.f32.mrf.mxu2  ;;  %v1910_v35 = vpop.f32.mrf.mxu1 }
 0x1bc   :  { %v1872_v36 = vadd.f32 %v1871_v33, %v1859_v24  ;;  %v1911_v46 = vadd.f32 %v1910_v35, %v1898_v44 }
 0x1bd   :  { %v1899_v23 = vpop.f32.mrf.mxu0 }
 0x1c1   :  { %v1884_v37 = vpop.f32.mrf.mxu3 }
 0x1c2   :  { %v1885_v38 = vadd.f32 %v1884_v37, %v1872_v36 }
 0x1c3   :  { %v1873_v39 = vpop.f32.mrf.mxu2  ;;  %v1912_v40 = vpop.f32.mrf.mxu1 }
 0x1c4   :  { %2097 = vst [vmem:[#allocation10 + $0x8] sm:$0xff] %v1885_v38 }
 0x1c9   :  { %v1886_v42 = vpop.f32.mrf.mxu3 }
 0x1cb   :  { %v1923_v43 = vpop.f32.mrf.mxu2 }
 0x1cc   :  { %v1924_v47 = vadd.f32 %v1923_v43, %v1911_v46 }
 0x1d1   :  { %v1936_v48 = vpop.f32.mrf.mxu3 }
 0x1d2   :  { %v1937_v50 = vadd.f32 %v1936_v48, %v1924_v47 }
 0x1d3   :  { %v1925_v51 = vpop.f32.mrf.mxu2 }
 0x1d4   :  { %2098 = vst [vmem:[#allocation10 + $0x10] sm:$0xff] %v1937_v50 }
 0x1d5   :  { %v1949_v49 = vpop.f32.mrf.mxu0 }
 0x1d6   :  { %v1950_v58 = vadd.f32 %v1949_v49, %v815_v56 }
 0x1d9   :  { %v1938_v53 = vpop.f32.mrf.mxu3 }
 0x1db   :  { %v1962_v52 = vpop.f32.mrf.mxu1 }
 0x1dc   :  { %v1963_v59 = vadd.f32 %v1962_v52, %v1950_v58 }
 0x1dd   :  { %v1951_v54 = vpop.f32.mrf.mxu0 }
 0x1e3   :  { %v1964_v55 = vpop.f32.mrf.mxu1 }
 0x1eb   :  { %v1975_v57 = vpop.f32.mrf.mxu2 }
 0x1ec   :  { %v1976_v60 = vadd.f32 %v1975_v57, %v1963_v59 }
 0x1f1   :  { %v1988_v61 = vpop.f32.mrf.mxu3 }
 0x1f2   :  { %v1989_v62 = vadd.f32 %v1988_v61, %v1976_v60 }
 0x1f3   :  { %v1977_v0 = vpop.f32.mrf.mxu2 }
 0x1f4   :  { %2099 = vst [vmem:[#allocation10 + $0x18] sm:$0xff] %v1989_v62 }
 0x1f5   :  { %v2001_v63 = vpop.f32.mrf.mxu0 }
 0x1f6   :  { %v2002_v6 = vadd.f32 %v2001_v63, %v816_v30 }
 0x1f9   :  { %v1990_v2 = vpop.f32.mrf.mxu3 }
 0x1fb   :  { %v2014_v1 = vpop.f32.mrf.mxu1 }
 0x1fc   :  { %v2015_v8 = vadd.f32 %v2014_v1, %v2002_v6 }
 0x1fd   :  { %v2003_v3 = vpop.f32.mrf.mxu0 }
 0x203   :  { %v2016_v4 = vpop.f32.mrf.mxu1 }
 0x20b   :  { %v2027_v5 = vpop.f32.mrf.mxu2 }
 0x20c   :  { %v2028_v9 = vadd.f32 %v2027_v5, %v2015_v8 }
 0x211   :  { %v2040_v10 = vpop.f32.mrf.mxu3 }
 0x212   :  { %v2041_v11 = vadd.f32 %v2040_v10, %v2028_v9 }
 0x213   :  { %v2029_v14 = vpop.f32.mrf.mxu2 }
 0x214   :  { %2100 = vst [vmem:[#allocation10 + $0x20] sm:$0xff] %v2041_v11 }
 0x215   :  { %v2053_v12 = vpop.f32.mrf.mxu0 }
 0x216   :  { %v2054_v19 = vadd.f32 %v2053_v12, %v817_v18 }
 0x219   :  { %v2042_v45 = vpop.f32.mrf.mxu3 }
 0x21b   :  { %v2066_v15 = vpop.f32.mrf.mxu1 }
 0x21c   :  { %v2067_v21 = vadd.f32 %v2066_v15, %v2054_v19 }
 0x21d   :  { %v2055_v13 = vpop.f32.mrf.mxu0 }
 0x223   :  { %v2068_v17 = vpop.f32.mrf.mxu1 }
 0x22b   :  { %v2079_v20 = vpop.f32.mrf.mxu2 }
 0x22c   :  { %v2080_v22 = vadd.f32 %v2079_v20, %v2067_v21 }
 0x231   :  { %v2092_v25 = vpop.f32.mrf.mxu3 }
 0x232   :  { %v2093_v26 = vadd.f32 %v2092_v25, %v2080_v22 }
 0x233   :  { %v2081_v7 = vpop.f32.mrf.mxu2 }
 0x234   :  { %2101 = vst [vmem:[#allocation10 + $0x28] sm:$0xff] %v2093_v26 }
 0x235   :  { %2112 = dma.vmem_to_hbm [thread:$0]  %s2108_s25, 768, %s2110_s28, [#allocation4]  }
 0x239   :  { %v2094_v27 = vpop.f32.mrf.mxu3 }
 0x23a   :  { %3538 = dma.done.wait [#allocation4], 768  }
 0x23b   :  { %3539 = vsyncadd [#allocation4], 4294966528 }
 0x23c   :  { %2117 = vsyncpa [#allocation3], 1 }
 0x23d   :  { %2118 = vsyncpa [#allocation6], 1 }
 0x23e   :  { %2119 = vsyncpa [#allocation9], 1 }
 0x23f   :  { %2120 = vsyncpa [#allocation4], 1 }

</bundles_post_ra>
